<compile_context>
chip_gen: v5e
topology: v5e:2x2
jax: 0.10.0
libtpu: 0.0.40
codegen_flags: <defaults>
</compile_context>

<pallas_src>
import functools
import math

import jax
import jax.numpy as jnp
from jax.experimental import pallas as pl
from jax.experimental.pallas import tpu as pltpu


# ---------------------------------------------------------------------------
# In-kernel helpers (operate on VMEM values)
# ---------------------------------------------------------------------------

def _layer_norm(x, gamma, beta, eps=1e-5):
    mu = jnp.mean(x, axis=-1, keepdims=True)
    xc = x - mu
    var = jnp.mean(xc * xc, axis=-1, keepdims=True)
    return xc * jax.lax.rsqrt(var + eps) * gamma + beta


def _mha(x_q, x_kv, x_v, key_bias, wqkv, bqkv, wo, bo, nhead):
    """Multi-head attention on a single batch element.

    x_q: (Lq, D); x_kv/x_v: (Lk, D); key_bias: (1, Lk) additive (-1e9 at pads);
    wqkv: (D, 3D) pre-transposed; bqkv: (1, 3D); wo: (D, D) pre-transposed; bo: (1, D).
    """
    Lq, D = x_q.shape
    hd = D // nhead
    scale = 1.0 / math.sqrt(hd)

    q = jnp.dot(x_q, wqkv[:, 0:D], preferred_element_type=jnp.float32) + bqkv[:, 0:D]
    k = jnp.dot(x_kv, wqkv[:, D:2 * D], preferred_element_type=jnp.float32) + bqkv[:, D:2 * D]
    v = jnp.dot(x_v, wqkv[:, 2 * D:3 * D], preferred_element_type=jnp.float32) + bqkv[:, 2 * D:3 * D]

    acc = jnp.zeros((Lq, D), jnp.float32)
    for h in range(nhead):                      # static unroll over heads
        lo, hi = h * hd, (h + 1) * hd
        qh, kh, vh = q[:, lo:hi], k[:, lo:hi], v[:, lo:hi]
        # scores = Qh @ Kh^T (contract last dims; no explicit transpose)
        s = jax.lax.dot_general(qh, kh, (((1,), (1,)), ((), ())),
                                preferred_element_type=jnp.float32) * scale
        s = s + key_bias                        # (Lq, Lk) + (1, Lk)
        m = jnp.max(s, axis=-1, keepdims=True)
        p = jnp.exp(s - m)
        p = p / jnp.sum(p, axis=-1, keepdims=True)
        oh = jnp.dot(p, vh, preferred_element_type=jnp.float32)
        # concat(heads) @ Wo  ==  sum_h  O_h @ Wo[h*hd:(h+1)*hd, :]   (no lane concat)
        acc = acc + jnp.dot(oh, wo[lo:hi, :], preferred_element_type=jnp.float32)
    return acc + bo


# ---------------------------------------------------------------------------
# Fused encoder-layer kernel (one grid step = one batch element)
# ---------------------------------------------------------------------------

def _encoder_layer_kernel(vid_ref, txt_ref, vpos_ref, tpos_ref, vbias_ref, tbias_ref,
                          sa_wqkv_ref, sa_bqkv_ref, sa_wo_ref, sa_bo_ref,
                          ca_wqkv_ref, ca_bqkv_ref, ca_wo_ref, ca_bo_ref,
                          w1_ref, b1_ref, w2_ref, b2_ref, ng_ref, nb_ref,
                          out_ref, *, nhead):
    x = vid_ref[0]          # (Lv, D)
    t = txt_ref[0]          # (Lt, D)
    vp = vpos_ref[0]        # (Lv, D)
    tp = tpos_ref[0]        # (Lt, D)
    vb = vbias_ref[0]       # (1, Lv) additive key-padding bias
    tb = tbias_ref[0]       # (1, Lt)

    # ---- self-attention (q = k = vid + pos, v = vid) + residual + norm1
    qk = x + vp
    sa = _mha(qk, qk, x, vb, sa_wqkv_ref[...], sa_bqkv_ref[...],
              sa_wo_ref[...], sa_bo_ref[...], nhead)
    x = _layer_norm(x + sa, ng_ref[0:1, :], nb_ref[0:1, :])

    # ---- cross-attention (q = vid + pos, k = txt + pos, v = txt) + residual + norm2
    ca = _mha(x + vp, t + tp, t, tb, ca_wqkv_ref[...], ca_bqkv_ref[...],
              ca_wo_ref[...], ca_bo_ref[...], nhead)
    x = _layer_norm(x + ca, ng_ref[1:2, :], nb_ref[1:2, :])

    # ---- FFN (linear1 -> relu -> linear2) + residual + norm3
    h = jnp.maximum(
        jnp.dot(x, w1_ref[...], preferred_element_type=jnp.float32) + b1_ref[...], 0.0)
    f = jnp.dot(h, w2_ref[...], preferred_element_type=jnp.float32) + b2_ref[...]
    x = _layer_norm(x + f, ng_ref[2:3, :], nb_ref[2:3, :])

    out_ref[0] = x          # single full-width (Lv, D) store


def encoder_layer_forward(vid, txt, vbias, tbias, vpos, tpos, params, *, nhead):
    """One VideoCenteredEncoderLayer, batch-first inputs, fused in one pallas_call."""
    B, Lv, D = vid.shape

    def batched(a):
        return pl.BlockSpec((1,) + a.shape[1:],
                            lambda b, _nd=a.ndim: (b,) + (0,) * (_nd - 1))

    def shared(a):
        return pl.BlockSpec(a.shape, lambda b, _nd=a.ndim: (0,) * _nd)

    data = (vid, txt, vpos, tpos, vbias, tbias)
    weights = (params['sa_wqkv'], params['sa_bqkv'], params['sa_wo'], params['sa_bo'],
               params['ca_wqkv'], params['ca_bqkv'], params['ca_wo'], params['ca_bo'],
               params['w1'], params['b1'], params['w2'], params['b2'],
               params['ng'], params['nb'])
    in_specs = [batched(a) for a in data] + [shared(w) for w in weights]

    return pl.pallas_call(
        functools.partial(_encoder_layer_kernel, nhead=nhead),
        out_shape=jax.ShapeDtypeStruct((B, Lv, D), jnp.float32),
        grid=(B,),
        in_specs=in_specs,
        out_specs=pl.BlockSpec((1, Lv, D), lambda b: (b, 0, 0)),
        compiler_params=pltpu.CompilerParams(dimension_semantics=("parallel",)),
    )(*data, *weights)


def video_centered_encoder_forward(layer_params, vid_src, txt_src, vid_mask,
                                   txt_mask, vid_pos, txt_pos, *, nhead):
    """VideoCenteredEncoder.forward.

    Batch-first inputs: vid_src (B, Lv, D), txt_src (B, Lt, D),
    vid_mask/txt_mask (B, L) bool (True = padded), vid_pos/txt_pos like srcs.
    Returns the PyTorch (seq-first) triple:
      (cat(pos) (Lv+Lt, B, D), cat(mask) (B, Lv+Lt), cat(memory) (Lv+Lt, B, D)).
    """
    vbias = jnp.where(vid_mask, -1e9, 0.0).astype(jnp.float32)[:, None, :]   # (B,1,Lv)
    tbias = jnp.where(txt_mask, -1e9, 0.0).astype(jnp.float32)[:, None, :]   # (B,1,Lt)

    x = vid_src
    for p in layer_params:
        x = encoder_layer_forward(x, txt_src, vbias, tbias, vid_pos, txt_pos, p,
                                  nhead=nhead)

    # normalize_before=False => no final norm. Permutes/concats are pure layout (XLA).
    to_sbd = lambda a: jnp.transpose(a, (1, 0, 2))
    pos_cat = jnp.concatenate([to_sbd(vid_pos), to_sbd(txt_pos)], axis=0)
    mask_cat = jnp.concatenate([vid_mask, txt_mask], axis=1)
    memory = jnp.concatenate([to_sbd(x), to_sbd(txt_src)], axis=0)
    return pos_cat, mask_cat, memory


# ---------------------------------------------------------------------------
# Parameter construction (weights stored pre-transposed: y = x @ W + b)
# ---------------------------------------------------------------------------

def init_layer_params(key, d_model, nhead, dim_ff):
    ks = jax.random.split(key, 12)

    def xavier(k, fan_in, fan_out):
        lim = math.sqrt(6.0 / (fan_in + fan_out))
        return jax.random.uniform(k, (fan_in, fan_out), jnp.float32, -lim, lim)

    def small(k, n):
        return 0.02 * jax.random.normal(k, (1, n), jnp.float32)

    return {
        'sa_wqkv': xavier(ks[0], d_model, 3 * d_model),
        'sa_bqkv': small(ks[1], 3 * d_model),
        'sa_wo':   xavier(ks[2], d_model, d_model),
        'sa_bo':   small(ks[3], d_model),
        'ca_wqkv': xavier(ks[4], d_model, 3 * d_model),
        'ca_bqkv': small(ks[5], 3 * d_model),
        'ca_wo':   xavier(ks[6], d_model, d_model),
        'ca_bo':   small(ks[7], d_model),
        'w1':      xavier(ks[8], d_model, dim_ff),
        'b1':      small(ks[9], dim_ff),
        'w2':      xavier(ks[10], dim_ff, d_model),
        'b2':      small(ks[11], d_model),
        'ng':      jnp.ones((3, d_model), jnp.float32),   # norm1/2/3 gamma
        'nb':      jnp.zeros((3, d_model), jnp.float32),  # norm1/2/3 beta
    }


# ---------------------------------------------------------------------------
# Pure-JAX reference (matches PyTorch eval forward)
# ---------------------------------------------------------------------------

def _ln_ref(x, gamma, beta, eps=1e-5):
    mu = jnp.mean(x, axis=-1, keepdims=True)
    xc = x - mu
    var = jnp.mean(xc * xc, axis=-1, keepdims=True)
    return xc * jax.lax.rsqrt(var + eps) * gamma + beta


def _mha_ref(x_q, x_kv, x_v, key_bias, wqkv, bqkv, wo, bo, nhead):
    hp = jax.lax.Precision.HIGHEST
    B, Lq, D = x_q.shape
    hd = D // nhead
    q = jnp.einsum('bld,de->ble', x_q, wqkv[:, 0:D], precision=hp) + bqkv[:, 0:D]
    k = jnp.einsum('bld,de->ble', x_kv, wqkv[:, D:2 * D], precision=hp) + bqkv[:, D:2 * D]
    v = jnp.einsum('bld,de->ble', x_v, wqkv[:, 2 * D:], precision=hp) + bqkv[:, 2 * D:]
    q = q.reshape(B, Lq, nhead, hd)
    k = k.reshape(B, -1, nhead, hd)
    v = v.reshape(B, -1, nhead, hd)
    s = jnp.einsum('bqhd,bkhd->bhqk', q, k, precision=hp) / math.sqrt(hd)
    s = s + key_bias[:, :, None, :]            # (B,1,Lk) -> (B,1,1,Lk)
    p = jax.nn.softmax(s, axis=-1)
    o = jnp.einsum('bhqk,bkhd->bqhd', p, v, precision=hp).reshape(B, Lq, D)
    return jnp.einsum('bld,de->ble', o, wo, precision=hp) + bo


def _encoder_ref(layer_params, vid_src, txt_src, vid_mask, txt_mask, vid_pos,
                 txt_pos, *, nhead):
    hp = jax.lax.Precision.HIGHEST
    vbias = jnp.where(vid_mask, -1e9, 0.0).astype(jnp.float32)[:, None, :]
    tbias = jnp.where(txt_mask, -1e9, 0.0).astype(jnp.float32)[:, None, :]
    x = vid_src
    for p in layer_params:
        qk = x + vid_pos
        sa = _mha_ref(qk, qk, x, vbias, p['sa_wqkv'], p['sa_bqkv'],
                      p['sa_wo'], p['sa_bo'], nhead)
        x = _ln_ref(x + sa, p['ng'][0], p['nb'][0])
        ca = _mha_ref(x + vid_pos, txt_src + txt_pos, txt_src, tbias,
                      p['ca_wqkv'], p['ca_bqkv'], p['ca_wo'], p['ca_bo'], nhead)
        x = _ln_ref(x + ca, p['ng'][1], p['nb'][1])
        h = jnp.maximum(jnp.einsum('bld,df->blf', x, p['w1'], precision=hp) + p['b1'], 0.0)
        f = jnp.einsum('blf,fd->bld', h, p['w2'], precision=hp) + p['b2']
        x = _ln_ref(x + f, p['ng'][2], p['nb'][2])
    to_sbd = lambda a: jnp.transpose(a, (1, 0, 2))
    pos_cat = jnp.concatenate([to_sbd(vid_pos), to_sbd(txt_pos)], axis=0)
    mask_cat = jnp.concatenate([vid_mask, txt_mask], axis=1)
    memory = jnp.concatenate([to_sbd(x), to_sbd(txt_src)], axis=0)
    return pos_cat, mask_cat, memory


if __name__ == "__main__":
    key = jax.random.PRNGKey(0)
    B, Lv, Lt = 2, 16, 8
    d_model, nhead, dim_ff, num_layers = 32, 4, 64, 2

    keys = jax.random.split(key, 4 + num_layers)
    vid_src = jax.random.normal(keys[0], (B, Lv, d_model), jnp.float32)
    txt_src = jax.random.normal(keys[1], (B, Lt, d_model), jnp.float32)
    vid_pos = 0.1 * jax.random.normal(keys[2], (B, Lv, d_model), jnp.float32)
    txt_pos = 0.1 * jax.random.normal(keys[3], (B, Lt, d_model), jnp.float32)

    # key_padding masks (True = padded); keep at least one real key per row.
    vid_mask = jnp.zeros((B, Lv), jnp.bool_).at[1, Lv - 3:].set(True)
    txt_mask = jnp.zeros((B, Lt), jnp.bool_).at[1, Lt - 2:].set(True)

    layer_params = [init_layer_params(keys[4 + i], d_model, nhead, dim_ff)
                    for i in range(num_layers)]

    pos_cat, mask_cat, memory = video_centered_encoder_forward(
        layer_params, vid_src, txt_src, vid_mask, txt_mask, vid_pos, txt_pos,
        nhead=nhead)
    jax.block_until_ready(memory)

    r_pos, r_mask, r_mem = _encoder_ref(
        layer_params, vid_src, txt_src, vid_mask, txt_mask, vid_pos, txt_pos,
        nhead=nhead)

    assert pos_cat.shape == (Lv + Lt, B, d_model)
    assert mask_cat.shape == (B, Lv + Lt)
    assert memory.shape == (Lv + Lt, B, d_model)
    assert jnp.array_equal(mask_cat, r_mask)
    assert jnp.allclose(pos_cat, r_pos)
    # Tolerance accounts for TPU MXU matmul rounding vs HIGHEST-precision reference.
    assert jnp.allclose(memory, r_mem, atol=3e-2, rtol=3e-2), \
        float(jnp.max(jnp.abs(memory - r_mem)))
    print("KERNEL_OK")
</pallas_src>

<mosaic_0001>
module attributes {stable_mosaic.version = 11 : i64} {
  func.func @_encoder_layer_kernel(%arg0: i32, %arg1: memref<1x16x32xf32, #tpu.memory_space<vmem>>, %arg2: memref<1x8x32xf32, #tpu.memory_space<vmem>>, %arg3: memref<1x16x32xf32, #tpu.memory_space<vmem>>, %arg4: memref<1x8x32xf32, #tpu.memory_space<vmem>>, %arg5: memref<1x1x16xf32, #tpu.memory_space<vmem>>, %arg6: memref<1x1x8xf32, #tpu.memory_space<vmem>>, %arg7: memref<32x96xf32, #tpu.memory_space<vmem>>, %arg8: memref<1x96xf32, #tpu.memory_space<vmem>>, %arg9: memref<32x32xf32, #tpu.memory_space<vmem>>, %arg10: memref<1x32xf32, #tpu.memory_space<vmem>>, %arg11: memref<32x96xf32, #tpu.memory_space<vmem>>, %arg12: memref<1x96xf32, #tpu.memory_space<vmem>>, %arg13: memref<32x32xf32, #tpu.memory_space<vmem>>, %arg14: memref<1x32xf32, #tpu.memory_space<vmem>>, %arg15: memref<32x64xf32, #tpu.memory_space<vmem>>, %arg16: memref<1x64xf32, #tpu.memory_space<vmem>>, %arg17: memref<64x32xf32, #tpu.memory_space<vmem>>, %arg18: memref<1x32xf32, #tpu.memory_space<vmem>>, %arg19: memref<3x32xf32, #tpu.memory_space<vmem>>, %arg20: memref<3x32xf32, #tpu.memory_space<vmem>>, %arg21: memref<1x16x32xf32, #tpu.memory_space<vmem>>) attributes {dimension_semantics = [#tpu.dimension_semantics<parallel>], iteration_bounds = array<i64: 2>, scalar_prefetch = 0 : i64, scratch_operands = 0 : i64, tpu.core_type = #tpu.core_type<tc>, window_params = [{transform_indices = @transform_0, window_bounds = array<i64: 1, 16, 32>}, {transform_indices = @transform_1, window_bounds = array<i64: 1, 8, 32>}, {transform_indices = @transform_2, window_bounds = array<i64: 1, 16, 32>}, {transform_indices = @transform_3, window_bounds = array<i64: 1, 8, 32>}, {transform_indices = @transform_4, window_bounds = array<i64: 1, 1, 16>}, {transform_indices = @transform_5, window_bounds = array<i64: 1, 1, 8>}, {pipeline_mode = #tpu.pipeline_mode<synchronous>, transform_indices = @transform_6, window_bounds = array<i64: 32, 96>}, {pipeline_mode = #tpu.pipeline_mode<synchronous>, transform_indices = @transform_7, window_bounds = array<i64: 1, 96>}, {pipeline_mode = #tpu.pipeline_mode<synchronous>, transform_indices = @transform_8, window_bounds = array<i64: 32, 32>}, {pipeline_mode = #tpu.pipeline_mode<synchronous>, transform_indices = @transform_9, window_bounds = array<i64: 1, 32>}, {pipeline_mode = #tpu.pipeline_mode<synchronous>, transform_indices = @transform_10, window_bounds = array<i64: 32, 96>}, {pipeline_mode = #tpu.pipeline_mode<synchronous>, transform_indices = @transform_11, window_bounds = array<i64: 1, 96>}, {pipeline_mode = #tpu.pipeline_mode<synchronous>, transform_indices = @transform_12, window_bounds = array<i64: 32, 32>}, {pipeline_mode = #tpu.pipeline_mode<synchronous>, transform_indices = @transform_13, window_bounds = array<i64: 1, 32>}, {pipeline_mode = #tpu.pipeline_mode<synchronous>, transform_indices = @transform_14, window_bounds = array<i64: 32, 64>}, {pipeline_mode = #tpu.pipeline_mode<synchronous>, transform_indices = @transform_15, window_bounds = array<i64: 1, 64>}, {pipeline_mode = #tpu.pipeline_mode<synchronous>, transform_indices = @transform_16, window_bounds = array<i64: 64, 32>}, {pipeline_mode = #tpu.pipeline_mode<synchronous>, transform_indices = @transform_17, window_bounds = array<i64: 1, 32>}, {pipeline_mode = #tpu.pipeline_mode<synchronous>, transform_indices = @transform_18, window_bounds = array<i64: 3, 32>}, {pipeline_mode = #tpu.pipeline_mode<synchronous>, transform_indices = @transform_19, window_bounds = array<i64: 3, 32>}, {transform_indices = @transform_20, window_bounds = array<i64: 1, 16, 32>}]} {
    %c0 = arith.constant 0 : index
    %c0_0 = arith.constant 0 : index
    %c0_1 = arith.constant 0 : index
    %0 = vector.load %arg1[%c0, %c0_0, %c0_1] : memref<1x16x32xf32, #tpu.memory_space<vmem>>, vector<1x16x32xf32>
    %1 = vector.shape_cast %0 : vector<1x16x32xf32> to vector<16x32xf32>
    %c0_2 = arith.constant 0 : index
    %c0_3 = arith.constant 0 : index
    %c0_4 = arith.constant 0 : index
    %2 = vector.load %arg2[%c0_2, %c0_3, %c0_4] : memref<1x8x32xf32, #tpu.memory_space<vmem>>, vector<1x8x32xf32>
    %3 = vector.shape_cast %2 : vector<1x8x32xf32> to vector<8x32xf32>
    %c0_5 = arith.constant 0 : index
    %c0_6 = arith.constant 0 : index
    %c0_7 = arith.constant 0 : index
    %4 = vector.load %arg3[%c0_5, %c0_6, %c0_7] : memref<1x16x32xf32, #tpu.memory_space<vmem>>, vector<1x16x32xf32>
    %5 = vector.shape_cast %4 : vector<1x16x32xf32> to vector<16x32xf32>
    %c0_8 = arith.constant 0 : index
    %c0_9 = arith.constant 0 : index
    %c0_10 = arith.constant 0 : index
    %6 = vector.load %arg4[%c0_8, %c0_9, %c0_10] : memref<1x8x32xf32, #tpu.memory_space<vmem>>, vector<1x8x32xf32>
    %7 = vector.shape_cast %6 : vector<1x8x32xf32> to vector<8x32xf32>
    %c0_11 = arith.constant 0 : index
    %c0_12 = arith.constant 0 : index
    %c0_13 = arith.constant 0 : index
    %8 = vector.load %arg5[%c0_11, %c0_12, %c0_13] : memref<1x1x16xf32, #tpu.memory_space<vmem>>, vector<1x1x16xf32>
    %9 = vector.shape_cast %8 : vector<1x1x16xf32> to vector<1x16xf32>
    %c0_14 = arith.constant 0 : index
    %c0_15 = arith.constant 0 : index
    %c0_16 = arith.constant 0 : index
    %10 = vector.load %arg6[%c0_14, %c0_15, %c0_16] : memref<1x1x8xf32, #tpu.memory_space<vmem>>, vector<1x1x8xf32>
    %11 = vector.shape_cast %10 : vector<1x1x8xf32> to vector<1x8xf32>
    %12 = arith.addf %1, %5 : vector<16x32xf32>
    %c0_17 = arith.constant 0 : index
    %c0_18 = arith.constant 0 : index
    %13 = vector.load %arg7[%c0_17, %c0_18] : memref<32x96xf32, #tpu.memory_space<vmem>>, vector<32x96xf32>
    %c0_19 = arith.constant 0 : index
    %c0_20 = arith.constant 0 : index
    %14 = vector.load %arg8[%c0_19, %c0_20] : memref<1x96xf32, #tpu.memory_space<vmem>>, vector<1x96xf32>
    %c0_21 = arith.constant 0 : index
    %c0_22 = arith.constant 0 : index
    %15 = vector.load %arg9[%c0_21, %c0_22] : memref<32x32xf32, #tpu.memory_space<vmem>>, vector<32x32xf32>
    %c0_23 = arith.constant 0 : index
    %c0_24 = arith.constant 0 : index
    %16 = vector.load %arg10[%c0_23, %c0_24] : memref<1x32xf32, #tpu.memory_space<vmem>>, vector<1x32xf32>
    %17 = vector.extract_strided_slice %13 {offsets = [0, 0], sizes = [32, 32], strides = [1, 1]} : vector<32x96xf32> to vector<32x32xf32>
    %cst = arith.constant dense<0.000000e+00> : vector<16x32xf32>
    %18 = tpu.matmul %12, %17, %cst {dimension_numbers = #tpu.dot_dimension_numbers<[1], [0], [0], [1], [0, 0, 1, 1], [], []>} : vector<16x32xf32>, vector<32x32xf32>, vector<16x32xf32> -> vector<16x32xf32>
    %19 = vector.extract_strided_slice %14 {offsets = [0, 0], sizes = [1, 32], strides = [1, 1]} : vector<1x96xf32> to vector<1x32xf32>
    %20 = vector.broadcast %19 : vector<1x32xf32> to vector<16x32xf32>
    %21 = arith.addf %18, %20 : vector<16x32xf32>
    %22 = vector.extract_strided_slice %13 {offsets = [0, 32], sizes = [32, 32], strides = [1, 1]} : vector<32x96xf32> to vector<32x32xf32>
    %cst_25 = arith.constant dense<0.000000e+00> : vector<16x32xf32>
    %23 = tpu.matmul %12, %22, %cst_25 {dimension_numbers = #tpu.dot_dimension_numbers<[1], [0], [0], [1], [0, 0, 1, 1], [], []>} : vector<16x32xf32>, vector<32x32xf32>, vector<16x32xf32> -> vector<16x32xf32>
    %24 = vector.extract_strided_slice %14 {offsets = [0, 32], sizes = [1, 32], strides = [1, 1]} : vector<1x96xf32> to vector<1x32xf32>
    %25 = vector.broadcast %24 : vector<1x32xf32> to vector<16x32xf32>
    %26 = arith.addf %23, %25 : vector<16x32xf32>
    %27 = vector.extract_strided_slice %13 {offsets = [0, 64], sizes = [32, 32], strides = [1, 1]} : vector<32x96xf32> to vector<32x32xf32>
    %cst_26 = arith.constant dense<0.000000e+00> : vector<16x32xf32>
    %28 = tpu.matmul %1, %27, %cst_26 {dimension_numbers = #tpu.dot_dimension_numbers<[1], [0], [0], [1], [0, 0, 1, 1], [], []>} : vector<16x32xf32>, vector<32x32xf32>, vector<16x32xf32> -> vector<16x32xf32>
    %29 = vector.extract_strided_slice %14 {offsets = [0, 64], sizes = [1, 32], strides = [1, 1]} : vector<1x96xf32> to vector<1x32xf32>
    %30 = vector.broadcast %29 : vector<1x32xf32> to vector<16x32xf32>
    %31 = arith.addf %28, %30 : vector<16x32xf32>
    %cst_27 = arith.constant 0.000000e+00 : f32
    %32 = vector.broadcast %cst_27 : f32 to vector<16x32xf32>
    %33 = vector.extract_strided_slice %21 {offsets = [0, 0], sizes = [16, 8], strides = [1, 1]} : vector<16x32xf32> to vector<16x8xf32>
    %34 = vector.extract_strided_slice %26 {offsets = [0, 0], sizes = [16, 8], strides = [1, 1]} : vector<16x32xf32> to vector<16x8xf32>
    %35 = vector.extract_strided_slice %31 {offsets = [0, 0], sizes = [16, 8], strides = [1, 1]} : vector<16x32xf32> to vector<16x8xf32>
    %cst_28 = arith.constant dense<0.000000e+00> : vector<16x16xf32>
    %36 = tpu.matmul %33, %34, %cst_28 {dimension_numbers = #tpu.dot_dimension_numbers<[1], [1], [0], [0], [0, 0, 1, 0], [], []>} : vector<16x8xf32>, vector<16x8xf32>, vector<16x16xf32> -> vector<16x16xf32>
    %cst_29 = arith.constant 0.353553385 : f32
    %37 = vector.broadcast %cst_29 : f32 to vector<16x16xf32>
    %38 = arith.mulf %36, %37 : vector<16x16xf32>
    %39 = vector.broadcast %9 : vector<1x16xf32> to vector<16x16xf32>
    %40 = arith.addf %38, %39 : vector<16x16xf32>
    %cst_30 = arith.constant dense<0xFF800000> : vector<16xf32>
    %41 = vector.multi_reduction <maximumf>, %40, %cst_30 [1] : vector<16x16xf32> to vector<16xf32>
    %42 = vector.shape_cast %41 : vector<16xf32> to vector<16x1xf32>
    %43 = vector.broadcast %42 : vector<16x1xf32> to vector<16x16xf32>
    %44 = arith.subf %40, %43 : vector<16x16xf32>
    %45 = math.exp %44 : vector<16x16xf32>
    %cst_31 = arith.constant dense<0.000000e+00> : vector<16xf32>
    %46 = vector.multi_reduction <add>, %45, %cst_31 [1] : vector<16x16xf32> to vector<16xf32>
    %47 = vector.shape_cast %46 : vector<16xf32> to vector<16x1xf32>
    %48 = vector.broadcast %47 : vector<16x1xf32> to vector<16x16xf32>
    %49 = arith.divf %45, %48 : vector<16x16xf32>
    %cst_32 = arith.constant dense<0.000000e+00> : vector<16x8xf32>
    %50 = tpu.matmul %49, %35, %cst_32 {dimension_numbers = #tpu.dot_dimension_numbers<[1], [0], [0], [1], [0, 0, 1, 1], [], []>} : vector<16x16xf32>, vector<16x8xf32>, vector<16x8xf32> -> vector<16x8xf32>
    %51 = vector.extract_strided_slice %15 {offsets = [0, 0], sizes = [8, 32], strides = [1, 1]} : vector<32x32xf32> to vector<8x32xf32>
    %cst_33 = arith.constant dense<0.000000e+00> : vector<16x32xf32>
    %52 = tpu.matmul %50, %51, %cst_33 {dimension_numbers = #tpu.dot_dimension_numbers<[1], [0], [0], [1], [0, 0, 1, 1], [], []>} : vector<16x8xf32>, vector<8x32xf32>, vector<16x32xf32> -> vector<16x32xf32>
    %53 = arith.addf %32, %52 : vector<16x32xf32>
    %54 = vector.extract_strided_slice %21 {offsets = [0, 8], sizes = [16, 8], strides = [1, 1]} : vector<16x32xf32> to vector<16x8xf32>
    %55 = vector.extract_strided_slice %26 {offsets = [0, 8], sizes = [16, 8], strides = [1, 1]} : vector<16x32xf32> to vector<16x8xf32>
    %56 = vector.extract_strided_slice %31 {offsets = [0, 8], sizes = [16, 8], strides = [1, 1]} : vector<16x32xf32> to vector<16x8xf32>
    %cst_34 = arith.constant dense<0.000000e+00> : vector<16x16xf32>
    %57 = tpu.matmul %54, %55, %cst_34 {dimension_numbers = #tpu.dot_dimension_numbers<[1], [1], [0], [0], [0, 0, 1, 0], [], []>} : vector<16x8xf32>, vector<16x8xf32>, vector<16x16xf32> -> vector<16x16xf32>
    %cst_35 = arith.constant 0.353553385 : f32
    %58 = vector.broadcast %cst_35 : f32 to vector<16x16xf32>
    %59 = arith.mulf %57, %58 : vector<16x16xf32>
    %60 = vector.broadcast %9 : vector<1x16xf32> to vector<16x16xf32>
    %61 = arith.addf %59, %60 : vector<16x16xf32>
    %cst_36 = arith.constant dense<0xFF800000> : vector<16xf32>
    %62 = vector.multi_reduction <maximumf>, %61, %cst_36 [1] : vector<16x16xf32> to vector<16xf32>
    %63 = vector.shape_cast %62 : vector<16xf32> to vector<16x1xf32>
    %64 = vector.broadcast %63 : vector<16x1xf32> to vector<16x16xf32>
    %65 = arith.subf %61, %64 : vector<16x16xf32>
    %66 = math.exp %65 : vector<16x16xf32>
    %cst_37 = arith.constant dense<0.000000e+00> : vector<16xf32>
    %67 = vector.multi_reduction <add>, %66, %cst_37 [1] : vector<16x16xf32> to vector<16xf32>
    %68 = vector.shape_cast %67 : vector<16xf32> to vector<16x1xf32>
    %69 = vector.broadcast %68 : vector<16x1xf32> to vector<16x16xf32>
    %70 = arith.divf %66, %69 : vector<16x16xf32>
    %cst_38 = arith.constant dense<0.000000e+00> : vector<16x8xf32>
    %71 = tpu.matmul %70, %56, %cst_38 {dimension_numbers = #tpu.dot_dimension_numbers<[1], [0], [0], [1], [0, 0, 1, 1], [], []>} : vector<16x16xf32>, vector<16x8xf32>, vector<16x8xf32> -> vector<16x8xf32>
    %72 = vector.extract_strided_slice %15 {offsets = [8, 0], sizes = [8, 32], strides = [1, 1]} : vector<32x32xf32> to vector<8x32xf32>
    %cst_39 = arith.constant dense<0.000000e+00> : vector<16x32xf32>
    %73 = tpu.matmul %71, %72, %cst_39 {dimension_numbers = #tpu.dot_dimension_numbers<[1], [0], [0], [1], [0, 0, 1, 1], [], []>} : vector<16x8xf32>, vector<8x32xf32>, vector<16x32xf32> -> vector<16x32xf32>
    %74 = arith.addf %53, %73 : vector<16x32xf32>
    %75 = vector.extract_strided_slice %21 {offsets = [0, 16], sizes = [16, 8], strides = [1, 1]} : vector<16x32xf32> to vector<16x8xf32>
    %76 = vector.extract_strided_slice %26 {offsets = [0, 16], sizes = [16, 8], strides = [1, 1]} : vector<16x32xf32> to vector<16x8xf32>
    %77 = vector.extract_strided_slice %31 {offsets = [0, 16], sizes = [16, 8], strides = [1, 1]} : vector<16x32xf32> to vector<16x8xf32>
    %cst_40 = arith.constant dense<0.000000e+00> : vector<16x16xf32>
    %78 = tpu.matmul %75, %76, %cst_40 {dimension_numbers = #tpu.dot_dimension_numbers<[1], [1], [0], [0], [0, 0, 1, 0], [], []>} : vector<16x8xf32>, vector<16x8xf32>, vector<16x16xf32> -> vector<16x16xf32>
    %cst_41 = arith.constant 0.353553385 : f32
    %79 = vector.broadcast %cst_41 : f32 to vector<16x16xf32>
    %80 = arith.mulf %78, %79 : vector<16x16xf32>
    %81 = vector.broadcast %9 : vector<1x16xf32> to vector<16x16xf32>
    %82 = arith.addf %80, %81 : vector<16x16xf32>
    %cst_42 = arith.constant dense<0xFF800000> : vector<16xf32>
    %83 = vector.multi_reduction <maximumf>, %82, %cst_42 [1] : vector<16x16xf32> to vector<16xf32>
    %84 = vector.shape_cast %83 : vector<16xf32> to vector<16x1xf32>
    %85 = vector.broadcast %84 : vector<16x1xf32> to vector<16x16xf32>
    %86 = arith.subf %82, %85 : vector<16x16xf32>
    %87 = math.exp %86 : vector<16x16xf32>
    %cst_43 = arith.constant dense<0.000000e+00> : vector<16xf32>
    %88 = vector.multi_reduction <add>, %87, %cst_43 [1] : vector<16x16xf32> to vector<16xf32>
    %89 = vector.shape_cast %88 : vector<16xf32> to vector<16x1xf32>
    %90 = vector.broadcast %89 : vector<16x1xf32> to vector<16x16xf32>
    %91 = arith.divf %87, %90 : vector<16x16xf32>
    %cst_44 = arith.constant dense<0.000000e+00> : vector<16x8xf32>
    %92 = tpu.matmul %91, %77, %cst_44 {dimension_numbers = #tpu.dot_dimension_numbers<[1], [0], [0], [1], [0, 0, 1, 1], [], []>} : vector<16x16xf32>, vector<16x8xf32>, vector<16x8xf32> -> vector<16x8xf32>
    %93 = vector.extract_strided_slice %15 {offsets = [16, 0], sizes = [8, 32], strides = [1, 1]} : vector<32x32xf32> to vector<8x32xf32>
    %cst_45 = arith.constant dense<0.000000e+00> : vector<16x32xf32>
    %94 = tpu.matmul %92, %93, %cst_45 {dimension_numbers = #tpu.dot_dimension_numbers<[1], [0], [0], [1], [0, 0, 1, 1], [], []>} : vector<16x8xf32>, vector<8x32xf32>, vector<16x32xf32> -> vector<16x32xf32>
    %95 = arith.addf %74, %94 : vector<16x32xf32>
    %96 = vector.extract_strided_slice %21 {offsets = [0, 24], sizes = [16, 8], strides = [1, 1]} : vector<16x32xf32> to vector<16x8xf32>
    %97 = vector.extract_strided_slice %26 {offsets = [0, 24], sizes = [16, 8], strides = [1, 1]} : vector<16x32xf32> to vector<16x8xf32>
    %98 = vector.extract_strided_slice %31 {offsets = [0, 24], sizes = [16, 8], strides = [1, 1]} : vector<16x32xf32> to vector<16x8xf32>
    %cst_46 = arith.constant dense<0.000000e+00> : vector<16x16xf32>
    %99 = tpu.matmul %96, %97, %cst_46 {dimension_numbers = #tpu.dot_dimension_numbers<[1], [1], [0], [0], [0, 0, 1, 0], [], []>} : vector<16x8xf32>, vector<16x8xf32>, vector<16x16xf32> -> vector<16x16xf32>
    %cst_47 = arith.constant 0.353553385 : f32
    %100 = vector.broadcast %cst_47 : f32 to vector<16x16xf32>
    %101 = arith.mulf %99, %100 : vector<16x16xf32>
    %102 = vector.broadcast %9 : vector<1x16xf32> to vector<16x16xf32>
    %103 = arith.addf %101, %102 : vector<16x16xf32>
    %cst_48 = arith.constant dense<0xFF800000> : vector<16xf32>
    %104 = vector.multi_reduction <maximumf>, %103, %cst_48 [1] : vector<16x16xf32> to vector<16xf32>
    %105 = vector.shape_cast %104 : vector<16xf32> to vector<16x1xf32>
    %106 = vector.broadcast %105 : vector<16x1xf32> to vector<16x16xf32>
    %107 = arith.subf %103, %106 : vector<16x16xf32>
    %108 = math.exp %107 : vector<16x16xf32>
    %cst_49 = arith.constant dense<0.000000e+00> : vector<16xf32>
    %109 = vector.multi_reduction <add>, %108, %cst_49 [1] : vector<16x16xf32> to vector<16xf32>
    %110 = vector.shape_cast %109 : vector<16xf32> to vector<16x1xf32>
    %111 = vector.broadcast %110 : vector<16x1xf32> to vector<16x16xf32>
    %112 = arith.divf %108, %111 : vector<16x16xf32>
    %cst_50 = arith.constant dense<0.000000e+00> : vector<16x8xf32>
    %113 = tpu.matmul %112, %98, %cst_50 {dimension_numbers = #tpu.dot_dimension_numbers<[1], [0], [0], [1], [0, 0, 1, 1], [], []>} : vector<16x16xf32>, vector<16x8xf32>, vector<16x8xf32> -> vector<16x8xf32>
    %114 = vector.extract_strided_slice %15 {offsets = [24, 0], sizes = [8, 32], strides = [1, 1]} : vector<32x32xf32> to vector<8x32xf32>
    %cst_51 = arith.constant dense<0.000000e+00> : vector<16x32xf32>
    %115 = tpu.matmul %113, %114, %cst_51 {dimension_numbers = #tpu.dot_dimension_numbers<[1], [0], [0], [1], [0, 0, 1, 1], [], []>} : vector<16x8xf32>, vector<8x32xf32>, vector<16x32xf32> -> vector<16x32xf32>
    %116 = arith.addf %95, %115 : vector<16x32xf32>
    %117 = vector.broadcast %16 : vector<1x32xf32> to vector<16x32xf32>
    %118 = arith.addf %116, %117 : vector<16x32xf32>
    %119 = arith.addf %1, %118 : vector<16x32xf32>
    %c0_52 = arith.constant 0 : index
    %c0_53 = arith.constant 0 : index
    %120 = vector.load %arg19[%c0_52, %c0_53] : memref<3x32xf32, #tpu.memory_space<vmem>>, vector<1x32xf32>
    %c0_54 = arith.constant 0 : index
    %c0_55 = arith.constant 0 : index
    %121 = vector.load %arg20[%c0_54, %c0_55] : memref<3x32xf32, #tpu.memory_space<vmem>>, vector<1x32xf32>
    %cst_56 = arith.constant dense<0.000000e+00> : vector<16xf32>
    %122 = vector.multi_reduction <add>, %119, %cst_56 [1] : vector<16x32xf32> to vector<16xf32>
    %123 = vector.shape_cast %122 : vector<16xf32> to vector<16x1xf32>
    %cst_57 = arith.constant 3.200000e+01 : f32
    %124 = vector.broadcast %cst_57 : f32 to vector<16x1xf32>
    %125 = arith.divf %123, %124 : vector<16x1xf32>
    %126 = vector.broadcast %125 : vector<16x1xf32> to vector<16x32xf32>
    %127 = arith.subf %119, %126 : vector<16x32xf32>
    %128 = arith.mulf %127, %127 : vector<16x32xf32>
    %cst_58 = arith.constant dense<0.000000e+00> : vector<16xf32>
    %129 = vector.multi_reduction <add>, %128, %cst_58 [1] : vector<16x32xf32> to vector<16xf32>
    %130 = vector.shape_cast %129 : vector<16xf32> to vector<16x1xf32>
    %cst_59 = arith.constant 3.200000e+01 : f32
    %131 = vector.broadcast %cst_59 : f32 to vector<16x1xf32>
    %132 = arith.divf %130, %131 : vector<16x1xf32>
    %cst_60 = arith.constant 9.99999974E-6 : f32
    %133 = vector.broadcast %cst_60 : f32 to vector<16x1xf32>
    %134 = arith.addf %132, %133 : vector<16x1xf32>
    %135 = math.rsqrt %134 : vector<16x1xf32>
    %136 = vector.broadcast %135 : vector<16x1xf32> to vector<16x32xf32>
    %137 = arith.mulf %127, %136 : vector<16x32xf32>
    %138 = vector.broadcast %120 : vector<1x32xf32> to vector<16x32xf32>
    %139 = arith.mulf %137, %138 : vector<16x32xf32>
    %140 = vector.broadcast %121 : vector<1x32xf32> to vector<16x32xf32>
    %141 = arith.addf %139, %140 : vector<16x32xf32>
    %142 = arith.addf %141, %5 : vector<16x32xf32>
    %143 = arith.addf %3, %7 : vector<8x32xf32>
    %c0_61 = arith.constant 0 : index
    %c0_62 = arith.constant 0 : index
    %144 = vector.load %arg11[%c0_61, %c0_62] : memref<32x96xf32, #tpu.memory_space<vmem>>, vector<32x96xf32>
    %c0_63 = arith.constant 0 : index
    %c0_64 = arith.constant 0 : index
    %145 = vector.load %arg12[%c0_63, %c0_64] : memref<1x96xf32, #tpu.memory_space<vmem>>, vector<1x96xf32>
    %c0_65 = arith.constant 0 : index
    %c0_66 = arith.constant 0 : index
    %146 = vector.load %arg13[%c0_65, %c0_66] : memref<32x32xf32, #tpu.memory_space<vmem>>, vector<32x32xf32>
    %c0_67 = arith.constant 0 : index
    %c0_68 = arith.constant 0 : index
    %147 = vector.load %arg14[%c0_67, %c0_68] : memref<1x32xf32, #tpu.memory_space<vmem>>, vector<1x32xf32>
    %148 = vector.extract_strided_slice %144 {offsets = [0, 0], sizes = [32, 32], strides = [1, 1]} : vector<32x96xf32> to vector<32x32xf32>
    %cst_69 = arith.constant dense<0.000000e+00> : vector<16x32xf32>
    %149 = tpu.matmul %142, %148, %cst_69 {dimension_numbers = #tpu.dot_dimension_numbers<[1], [0], [0], [1], [0, 0, 1, 1], [], []>} : vector<16x32xf32>, vector<32x32xf32>, vector<16x32xf32> -> vector<16x32xf32>
    %150 = vector.extract_strided_slice %145 {offsets = [0, 0], sizes = [1, 32], strides = [1, 1]} : vector<1x96xf32> to vector<1x32xf32>
    %151 = vector.broadcast %150 : vector<1x32xf32> to vector<16x32xf32>
    %152 = arith.addf %149, %151 : vector<16x32xf32>
    %153 = vector.extract_strided_slice %144 {offsets = [0, 32], sizes = [32, 32], strides = [1, 1]} : vector<32x96xf32> to vector<32x32xf32>
    %cst_70 = arith.constant dense<0.000000e+00> : vector<8x32xf32>
    %154 = tpu.matmul %143, %153, %cst_70 {dimension_numbers = #tpu.dot_dimension_numbers<[1], [0], [0], [1], [0, 0, 1, 1], [], []>} : vector<8x32xf32>, vector<32x32xf32>, vector<8x32xf32> -> vector<8x32xf32>
    %155 = vector.extract_strided_slice %145 {offsets = [0, 32], sizes = [1, 32], strides = [1, 1]} : vector<1x96xf32> to vector<1x32xf32>
    %156 = vector.broadcast %155 : vector<1x32xf32> to vector<8x32xf32>
    %157 = arith.addf %154, %156 : vector<8x32xf32>
    %158 = vector.extract_strided_slice %144 {offsets = [0, 64], sizes = [32, 32], strides = [1, 1]} : vector<32x96xf32> to vector<32x32xf32>
    %cst_71 = arith.constant dense<0.000000e+00> : vector<8x32xf32>
    %159 = tpu.matmul %3, %158, %cst_71 {dimension_numbers = #tpu.dot_dimension_numbers<[1], [0], [0], [1], [0, 0, 1, 1], [], []>} : vector<8x32xf32>, vector<32x32xf32>, vector<8x32xf32> -> vector<8x32xf32>
    %160 = vector.extract_strided_slice %145 {offsets = [0, 64], sizes = [1, 32], strides = [1, 1]} : vector<1x96xf32> to vector<1x32xf32>
    %161 = vector.broadcast %160 : vector<1x32xf32> to vector<8x32xf32>
    %162 = arith.addf %159, %161 : vector<8x32xf32>
    %cst_72 = arith.constant 0.000000e+00 : f32
    %163 = vector.broadcast %cst_72 : f32 to vector<16x32xf32>
    %164 = vector.extract_strided_slice %152 {offsets = [0, 0], sizes = [16, 8], strides = [1, 1]} : vector<16x32xf32> to vector<16x8xf32>
    %165 = vector.extract_strided_slice %157 {offsets = [0, 0], sizes = [8, 8], strides = [1, 1]} : vector<8x32xf32> to vector<8x8xf32>
    %166 = vector.extract_strided_slice %162 {offsets = [0, 0], sizes = [8, 8], strides = [1, 1]} : vector<8x32xf32> to vector<8x8xf32>
    %cst_73 = arith.constant dense<0.000000e+00> : vector<16x8xf32>
    %167 = tpu.matmul %164, %165, %cst_73 {dimension_numbers = #tpu.dot_dimension_numbers<[1], [1], [0], [0], [0, 0, 1, 0], [], []>} : vector<16x8xf32>, vector<8x8xf32>, vector<16x8xf32> -> vector<16x8xf32>
    %cst_74 = arith.constant 0.353553385 : f32
    %168 = vector.broadcast %cst_74 : f32 to vector<16x8xf32>
    %169 = arith.mulf %167, %168 : vector<16x8xf32>
    %170 = vector.broadcast %11 : vector<1x8xf32> to vector<16x8xf32>
    %171 = arith.addf %169, %170 : vector<16x8xf32>
    %cst_75 = arith.constant dense<0xFF800000> : vector<16xf32>
    %172 = vector.multi_reduction <maximumf>, %171, %cst_75 [1] : vector<16x8xf32> to vector<16xf32>
    %173 = vector.shape_cast %172 : vector<16xf32> to vector<16x1xf32>
    %174 = vector.broadcast %173 : vector<16x1xf32> to vector<16x8xf32>
    %175 = arith.subf %171, %174 : vector<16x8xf32>
    %176 = math.exp %175 : vector<16x8xf32>
    %cst_76 = arith.constant dense<0.000000e+00> : vector<16xf32>
    %177 = vector.multi_reduction <add>, %176, %cst_76 [1] : vector<16x8xf32> to vector<16xf32>
    %178 = vector.shape_cast %177 : vector<16xf32> to vector<16x1xf32>
    %179 = vector.broadcast %178 : vector<16x1xf32> to vector<16x8xf32>
    %180 = arith.divf %176, %179 : vector<16x8xf32>
    %cst_77 = arith.constant dense<0.000000e+00> : vector<16x8xf32>
    %181 = tpu.matmul %180, %166, %cst_77 {dimension_numbers = #tpu.dot_dimension_numbers<[1], [0], [0], [1], [0, 0, 1, 1], [], []>} : vector<16x8xf32>, vector<8x8xf32>, vector<16x8xf32> -> vector<16x8xf32>
    %182 = vector.extract_strided_slice %146 {offsets = [0, 0], sizes = [8, 32], strides = [1, 1]} : vector<32x32xf32> to vector<8x32xf32>
    %cst_78 = arith.constant dense<0.000000e+00> : vector<16x32xf32>
    %183 = tpu.matmul %181, %182, %cst_78 {dimension_numbers = #tpu.dot_dimension_numbers<[1], [0], [0], [1], [0, 0, 1, 1], [], []>} : vector<16x8xf32>, vector<8x32xf32>, vector<16x32xf32> -> vector<16x32xf32>
    %184 = arith.addf %163, %183 : vector<16x32xf32>
    %185 = vector.extract_strided_slice %152 {offsets = [0, 8], sizes = [16, 8], strides = [1, 1]} : vector<16x32xf32> to vector<16x8xf32>
    %186 = vector.extract_strided_slice %157 {offsets = [0, 8], sizes = [8, 8], strides = [1, 1]} : vector<8x32xf32> to vector<8x8xf32>
    %187 = vector.extract_strided_slice %162 {offsets = [0, 8], sizes = [8, 8], strides = [1, 1]} : vector<8x32xf32> to vector<8x8xf32>
    %cst_79 = arith.constant dense<0.000000e+00> : vector<16x8xf32>
    %188 = tpu.matmul %185, %186, %cst_79 {dimension_numbers = #tpu.dot_dimension_numbers<[1], [1], [0], [0], [0, 0, 1, 0], [], []>} : vector<16x8xf32>, vector<8x8xf32>, vector<16x8xf32> -> vector<16x8xf32>
    %cst_80 = arith.constant 0.353553385 : f32
    %189 = vector.broadcast %cst_80 : f32 to vector<16x8xf32>
    %190 = arith.mulf %188, %189 : vector<16x8xf32>
    %191 = vector.broadcast %11 : vector<1x8xf32> to vector<16x8xf32>
    %192 = arith.addf %190, %191 : vector<16x8xf32>
    %cst_81 = arith.constant dense<0xFF800000> : vector<16xf32>
    %193 = vector.multi_reduction <maximumf>, %192, %cst_81 [1] : vector<16x8xf32> to vector<16xf32>
    %194 = vector.shape_cast %193 : vector<16xf32> to vector<16x1xf32>
    %195 = vector.broadcast %194 : vector<16x1xf32> to vector<16x8xf32>
    %196 = arith.subf %192, %195 : vector<16x8xf32>
    %197 = math.exp %196 : vector<16x8xf32>
    %cst_82 = arith.constant dense<0.000000e+00> : vector<16xf32>
    %198 = vector.multi_reduction <add>, %197, %cst_82 [1] : vector<16x8xf32> to vector<16xf32>
    %199 = vector.shape_cast %198 : vector<16xf32> to vector<16x1xf32>
    %200 = vector.broadcast %199 : vector<16x1xf32> to vector<16x8xf32>
    %201 = arith.divf %197, %200 : vector<16x8xf32>
    %cst_83 = arith.constant dense<0.000000e+00> : vector<16x8xf32>
    %202 = tpu.matmul %201, %187, %cst_83 {dimension_numbers = #tpu.dot_dimension_numbers<[1], [0], [0], [1], [0, 0, 1, 1], [], []>} : vector<16x8xf32>, vector<8x8xf32>, vector<16x8xf32> -> vector<16x8xf32>
    %203 = vector.extract_strided_slice %146 {offsets = [8, 0], sizes = [8, 32], strides = [1, 1]} : vector<32x32xf32> to vector<8x32xf32>
    %cst_84 = arith.constant dense<0.000000e+00> : vector<16x32xf32>
    %204 = tpu.matmul %202, %203, %cst_84 {dimension_numbers = #tpu.dot_dimension_numbers<[1], [0], [0], [1], [0, 0, 1, 1], [], []>} : vector<16x8xf32>, vector<8x32xf32>, vector<16x32xf32> -> vector<16x32xf32>
    %205 = arith.addf %184, %204 : vector<16x32xf32>
    %206 = vector.extract_strided_slice %152 {offsets = [0, 16], sizes = [16, 8], strides = [1, 1]} : vector<16x32xf32> to vector<16x8xf32>
    %207 = vector.extract_strided_slice %157 {offsets = [0, 16], sizes = [8, 8], strides = [1, 1]} : vector<8x32xf32> to vector<8x8xf32>
    %208 = vector.extract_strided_slice %162 {offsets = [0, 16], sizes = [8, 8], strides = [1, 1]} : vector<8x32xf32> to vector<8x8xf32>
    %cst_85 = arith.constant dense<0.000000e+00> : vector<16x8xf32>
    %209 = tpu.matmul %206, %207, %cst_85 {dimension_numbers = #tpu.dot_dimension_numbers<[1], [1], [0], [0], [0, 0, 1, 0], [], []>} : vector<16x8xf32>, vector<8x8xf32>, vector<16x8xf32> -> vector<16x8xf32>
    %cst_86 = arith.constant 0.353553385 : f32
    %210 = vector.broadcast %cst_86 : f32 to vector<16x8xf32>
    %211 = arith.mulf %209, %210 : vector<16x8xf32>
    %212 = vector.broadcast %11 : vector<1x8xf32> to vector<16x8xf32>
    %213 = arith.addf %211, %212 : vector<16x8xf32>
    %cst_87 = arith.constant dense<0xFF800000> : vector<16xf32>
    %214 = vector.multi_reduction <maximumf>, %213, %cst_87 [1] : vector<16x8xf32> to vector<16xf32>
    %215 = vector.shape_cast %214 : vector<16xf32> to vector<16x1xf32>
    %216 = vector.broadcast %215 : vector<16x1xf32> to vector<16x8xf32>
    %217 = arith.subf %213, %216 : vector<16x8xf32>
    %218 = math.exp %217 : vector<16x8xf32>
    %cst_88 = arith.constant dense<0.000000e+00> : vector<16xf32>
    %219 = vector.multi_reduction <add>, %218, %cst_88 [1] : vector<16x8xf32> to vector<16xf32>
    %220 = vector.shape_cast %219 : vector<16xf32> to vector<16x1xf32>
    %221 = vector.broadcast %220 : vector<16x1xf32> to vector<16x8xf32>
    %222 = arith.divf %218, %221 : vector<16x8xf32>
    %cst_89 = arith.constant dense<0.000000e+00> : vector<16x8xf32>
    %223 = tpu.matmul %222, %208, %cst_89 {dimension_numbers = #tpu.dot_dimension_numbers<[1], [0], [0], [1], [0, 0, 1, 1], [], []>} : vector<16x8xf32>, vector<8x8xf32>, vector<16x8xf32> -> vector<16x8xf32>
    %224 = vector.extract_strided_slice %146 {offsets = [16, 0], sizes = [8, 32], strides = [1, 1]} : vector<32x32xf32> to vector<8x32xf32>
    %cst_90 = arith.constant dense<0.000000e+00> : vector<16x32xf32>
    %225 = tpu.matmul %223, %224, %cst_90 {dimension_numbers = #tpu.dot_dimension_numbers<[1], [0], [0], [1], [0, 0, 1, 1], [], []>} : vector<16x8xf32>, vector<8x32xf32>, vector<16x32xf32> -> vector<16x32xf32>
    %226 = arith.addf %205, %225 : vector<16x32xf32>
    %227 = vector.extract_strided_slice %152 {offsets = [0, 24], sizes = [16, 8], strides = [1, 1]} : vector<16x32xf32> to vector<16x8xf32>
    %228 = vector.extract_strided_slice %157 {offsets = [0, 24], sizes = [8, 8], strides = [1, 1]} : vector<8x32xf32> to vector<8x8xf32>
    %229 = vector.extract_strided_slice %162 {offsets = [0, 24], sizes = [8, 8], strides = [1, 1]} : vector<8x32xf32> to vector<8x8xf32>
    %cst_91 = arith.constant dense<0.000000e+00> : vector<16x8xf32>
    %230 = tpu.matmul %227, %228, %cst_91 {dimension_numbers = #tpu.dot_dimension_numbers<[1], [1], [0], [0], [0, 0, 1, 0], [], []>} : vector<16x8xf32>, vector<8x8xf32>, vector<16x8xf32> -> vector<16x8xf32>
    %cst_92 = arith.constant 0.353553385 : f32
    %231 = vector.broadcast %cst_92 : f32 to vector<16x8xf32>
    %232 = arith.mulf %230, %231 : vector<16x8xf32>
    %233 = vector.broadcast %11 : vector<1x8xf32> to vector<16x8xf32>
    %234 = arith.addf %232, %233 : vector<16x8xf32>
    %cst_93 = arith.constant dense<0xFF800000> : vector<16xf32>
    %235 = vector.multi_reduction <maximumf>, %234, %cst_93 [1] : vector<16x8xf32> to vector<16xf32>
    %236 = vector.shape_cast %235 : vector<16xf32> to vector<16x1xf32>
    %237 = vector.broadcast %236 : vector<16x1xf32> to vector<16x8xf32>
    %238 = arith.subf %234, %237 : vector<16x8xf32>
    %239 = math.exp %238 : vector<16x8xf32>
    %cst_94 = arith.constant dense<0.000000e+00> : vector<16xf32>
    %240 = vector.multi_reduction <add>, %239, %cst_94 [1] : vector<16x8xf32> to vector<16xf32>
    %241 = vector.shape_cast %240 : vector<16xf32> to vector<16x1xf32>
    %242 = vector.broadcast %241 : vector<16x1xf32> to vector<16x8xf32>
    %243 = arith.divf %239, %242 : vector<16x8xf32>
    %cst_95 = arith.constant dense<0.000000e+00> : vector<16x8xf32>
    %244 = tpu.matmul %243, %229, %cst_95 {dimension_numbers = #tpu.dot_dimension_numbers<[1], [0], [0], [1], [0, 0, 1, 1], [], []>} : vector<16x8xf32>, vector<8x8xf32>, vector<16x8xf32> -> vector<16x8xf32>
    %245 = vector.extract_strided_slice %146 {offsets = [24, 0], sizes = [8, 32], strides = [1, 1]} : vector<32x32xf32> to vector<8x32xf32>
    %cst_96 = arith.constant dense<0.000000e+00> : vector<16x32xf32>
    %246 = tpu.matmul %244, %245, %cst_96 {dimension_numbers = #tpu.dot_dimension_numbers<[1], [0], [0], [1], [0, 0, 1, 1], [], []>} : vector<16x8xf32>, vector<8x32xf32>, vector<16x32xf32> -> vector<16x32xf32>
    %247 = arith.addf %226, %246 : vector<16x32xf32>
    %248 = vector.broadcast %147 : vector<1x32xf32> to vector<16x32xf32>
    %249 = arith.addf %247, %248 : vector<16x32xf32>
    %250 = arith.addf %141, %249 : vector<16x32xf32>
    %c1 = arith.constant 1 : index
    %c0_97 = arith.constant 0 : index
    %251 = vector.load %arg19[%c1, %c0_97] : memref<3x32xf32, #tpu.memory_space<vmem>>, vector<1x32xf32>
    %c1_98 = arith.constant 1 : index
    %c0_99 = arith.constant 0 : index
    %252 = vector.load %arg20[%c1_98, %c0_99] : memref<3x32xf32, #tpu.memory_space<vmem>>, vector<1x32xf32>
    %cst_100 = arith.constant dense<0.000000e+00> : vector<16xf32>
    %253 = vector.multi_reduction <add>, %250, %cst_100 [1] : vector<16x32xf32> to vector<16xf32>
    %254 = vector.shape_cast %253 : vector<16xf32> to vector<16x1xf32>
    %cst_101 = arith.constant 3.200000e+01 : f32
    %255 = vector.broadcast %cst_101 : f32 to vector<16x1xf32>
    %256 = arith.divf %254, %255 : vector<16x1xf32>
    %257 = vector.broadcast %256 : vector<16x1xf32> to vector<16x32xf32>
    %258 = arith.subf %250, %257 : vector<16x32xf32>
    %259 = arith.mulf %258, %258 : vector<16x32xf32>
    %cst_102 = arith.constant dense<0.000000e+00> : vector<16xf32>
    %260 = vector.multi_reduction <add>, %259, %cst_102 [1] : vector<16x32xf32> to vector<16xf32>
    %261 = vector.shape_cast %260 : vector<16xf32> to vector<16x1xf32>
    %cst_103 = arith.constant 3.200000e+01 : f32
    %262 = vector.broadcast %cst_103 : f32 to vector<16x1xf32>
    %263 = arith.divf %261, %262 : vector<16x1xf32>
    %cst_104 = arith.constant 9.99999974E-6 : f32
    %264 = vector.broadcast %cst_104 : f32 to vector<16x1xf32>
    %265 = arith.addf %263, %264 : vector<16x1xf32>
    %266 = math.rsqrt %265 : vector<16x1xf32>
    %267 = vector.broadcast %266 : vector<16x1xf32> to vector<16x32xf32>
    %268 = arith.mulf %258, %267 : vector<16x32xf32>
    %269 = vector.broadcast %251 : vector<1x32xf32> to vector<16x32xf32>
    %270 = arith.mulf %268, %269 : vector<16x32xf32>
    %271 = vector.broadcast %252 : vector<1x32xf32> to vector<16x32xf32>
    %272 = arith.addf %270, %271 : vector<16x32xf32>
    %c0_105 = arith.constant 0 : index
    %c0_106 = arith.constant 0 : index
    %273 = vector.load %arg15[%c0_105, %c0_106] : memref<32x64xf32, #tpu.memory_space<vmem>>, vector<32x64xf32>
    %cst_107 = arith.constant dense<0.000000e+00> : vector<16x64xf32>
    %274 = tpu.matmul %272, %273, %cst_107 {dimension_numbers = #tpu.dot_dimension_numbers<[1], [0], [0], [1], [0, 0, 1, 1], [], []>} : vector<16x32xf32>, vector<32x64xf32>, vector<16x64xf32> -> vector<16x64xf32>
    %c0_108 = arith.constant 0 : index
    %c0_109 = arith.constant 0 : index
    %275 = vector.load %arg16[%c0_108, %c0_109] : memref<1x64xf32, #tpu.memory_space<vmem>>, vector<1x64xf32>
    %276 = vector.broadcast %275 : vector<1x64xf32> to vector<16x64xf32>
    %277 = arith.addf %274, %276 : vector<16x64xf32>
    %cst_110 = arith.constant 0.000000e+00 : f32
    %278 = vector.broadcast %cst_110 : f32 to vector<16x64xf32>
    %279 = arith.maximumf %277, %278 : vector<16x64xf32>
    %c0_111 = arith.constant 0 : index
    %c0_112 = arith.constant 0 : index
    %280 = vector.load %arg17[%c0_111, %c0_112] : memref<64x32xf32, #tpu.memory_space<vmem>>, vector<64x32xf32>
    %cst_113 = arith.constant dense<0.000000e+00> : vector<16x32xf32>
    %281 = tpu.matmul %279, %280, %cst_113 {dimension_numbers = #tpu.dot_dimension_numbers<[1], [0], [0], [1], [0, 0, 1, 1], [], []>} : vector<16x64xf32>, vector<64x32xf32>, vector<16x32xf32> -> vector<16x32xf32>
    %c0_114 = arith.constant 0 : index
    %c0_115 = arith.constant 0 : index
    %282 = vector.load %arg18[%c0_114, %c0_115] : memref<1x32xf32, #tpu.memory_space<vmem>>, vector<1x32xf32>
    %283 = vector.broadcast %282 : vector<1x32xf32> to vector<16x32xf32>
    %284 = arith.addf %281, %283 : vector<16x32xf32>
    %285 = arith.addf %272, %284 : vector<16x32xf32>
    %c2 = arith.constant 2 : index
    %c0_116 = arith.constant 0 : index
    %286 = vector.load %arg19[%c2, %c0_116] : memref<3x32xf32, #tpu.memory_space<vmem>>, vector<1x32xf32>
    %c2_117 = arith.constant 2 : index
    %c0_118 = arith.constant 0 : index
    %287 = vector.load %arg20[%c2_117, %c0_118] : memref<3x32xf32, #tpu.memory_space<vmem>>, vector<1x32xf32>
    %cst_119 = arith.constant dense<0.000000e+00> : vector<16xf32>
    %288 = vector.multi_reduction <add>, %285, %cst_119 [1] : vector<16x32xf32> to vector<16xf32>
    %289 = vector.shape_cast %288 : vector<16xf32> to vector<16x1xf32>
    %cst_120 = arith.constant 3.200000e+01 : f32
    %290 = vector.broadcast %cst_120 : f32 to vector<16x1xf32>
    %291 = arith.divf %289, %290 : vector<16x1xf32>
    %292 = vector.broadcast %291 : vector<16x1xf32> to vector<16x32xf32>
    %293 = arith.subf %285, %292 : vector<16x32xf32>
    %294 = arith.mulf %293, %293 : vector<16x32xf32>
    %cst_121 = arith.constant dense<0.000000e+00> : vector<16xf32>
    %295 = vector.multi_reduction <add>, %294, %cst_121 [1] : vector<16x32xf32> to vector<16xf32>
    %296 = vector.shape_cast %295 : vector<16xf32> to vector<16x1xf32>
    %cst_122 = arith.constant 3.200000e+01 : f32
    %297 = vector.broadcast %cst_122 : f32 to vector<16x1xf32>
    %298 = arith.divf %296, %297 : vector<16x1xf32>
    %cst_123 = arith.constant 9.99999974E-6 : f32
    %299 = vector.broadcast %cst_123 : f32 to vector<16x1xf32>
    %300 = arith.addf %298, %299 : vector<16x1xf32>
    %301 = math.rsqrt %300 : vector<16x1xf32>
    %302 = vector.broadcast %301 : vector<16x1xf32> to vector<16x32xf32>
    %303 = arith.mulf %293, %302 : vector<16x32xf32>
    %304 = vector.broadcast %286 : vector<1x32xf32> to vector<16x32xf32>
    %305 = arith.mulf %303, %304 : vector<16x32xf32>
    %306 = vector.broadcast %287 : vector<1x32xf32> to vector<16x32xf32>
    %307 = arith.addf %305, %306 : vector<16x32xf32>
    %c0_124 = arith.constant 0 : index
    %c0_125 = arith.constant 0 : index
    %c0_126 = arith.constant 0 : index
    %308 = vector.load %arg21[%c0_124, %c0_125, %c0_126] : memref<1x16x32xf32, #tpu.memory_space<vmem>>, vector<1x16x32xf32>
    %309 = vector.shape_cast %308 : vector<1x16x32xf32> to vector<16x32xf32>
    %310 = vector.shape_cast %307 : vector<16x32xf32> to vector<1x16x32xf32>
    tpu.vector_store %arg21[%c0_124, %c0_125, %c0_126], %310 {strides = array<i32>} : memref<1x16x32xf32, #tpu.memory_space<vmem>>, vector<1x16x32xf32>,
    return
  }
  func.func @transform_0(%arg0: i32) -> (i32, i32, i32) {
    %c0_i32 = arith.constant 0 : i32
    %c0_i32_0 = arith.constant 0 : i32
    %c0_i32_1 = arith.constant 0 : i32
    return %arg0, %c0_i32, %c0_i32_0 : i32, i32, i32
  }
  func.func @transform_1(%arg0: i32) -> (i32, i32, i32) {
    %c0_i32 = arith.constant 0 : i32
    %c0_i32_0 = arith.constant 0 : i32
    %c0_i32_1 = arith.constant 0 : i32
    return %arg0, %c0_i32, %c0_i32_0 : i32, i32, i32
  }
  func.func @transform_2(%arg0: i32) -> (i32, i32, i32) {
    %c0_i32 = arith.constant 0 : i32
    %c0_i32_0 = arith.constant 0 : i32
    %c0_i32_1 = arith.constant 0 : i32
    return %arg0, %c0_i32, %c0_i32_0 : i32, i32, i32
  }
  func.func @transform_3(%arg0: i32) -> (i32, i32, i32) {
    %c0_i32 = arith.constant 0 : i32
    %c0_i32_0 = arith.constant 0 : i32
    %c0_i32_1 = arith.constant 0 : i32
    return %arg0, %c0_i32, %c0_i32_0 : i32, i32, i32
  }
  func.func @transform_4(%arg0: i32) -> (i32, i32, i32) {
    %c0_i32 = arith.constant 0 : i32
    %c0_i32_0 = arith.constant 0 : i32
    %c0_i32_1 = arith.constant 0 : i32
    return %arg0, %c0_i32, %c0_i32_0 : i32, i32, i32
  }
  func.func @transform_5(%arg0: i32) -> (i32, i32, i32) {
    %c0_i32 = arith.constant 0 : i32
    %c0_i32_0 = arith.constant 0 : i32
    %c0_i32_1 = arith.constant 0 : i32
    return %arg0, %c0_i32, %c0_i32_0 : i32, i32, i32
  }
  func.func @transform_6(%arg0: i32) -> (i32, i32) {
    %c0_i32 = arith.constant 0 : i32
    %c0_i32_0 = arith.constant 0 : i32
    %c0_i32_1 = arith.constant 0 : i32
    return %c0_i32, %c0_i32_0 : i32, i32
  }
  func.func @transform_7(%arg0: i32) -> (i32, i32) {
    %c0_i32 = arith.constant 0 : i32
    %c0_i32_0 = arith.constant 0 : i32
    %c0_i32_1 = arith.constant 0 : i32
    return %c0_i32, %c0_i32_0 : i32, i32
  }
  func.func @transform_8(%arg0: i32) -> (i32, i32) {
    %c0_i32 = arith.constant 0 : i32
    %c0_i32_0 = arith.constant 0 : i32
    %c0_i32_1 = arith.constant 0 : i32
    return %c0_i32, %c0_i32_0 : i32, i32
  }
  func.func @transform_9(%arg0: i32) -> (i32, i32) {
    %c0_i32 = arith.constant 0 : i32
    %c0_i32_0 = arith.constant 0 : i32
    %c0_i32_1 = arith.constant 0 : i32
    return %c0_i32, %c0_i32_0 : i32, i32
  }
  func.func @transform_10(%arg0: i32) -> (i32, i32) {
    %c0_i32 = arith.constant 0 : i32
    %c0_i32_0 = arith.constant 0 : i32
    %c0_i32_1 = arith.constant 0 : i32
    return %c0_i32, %c0_i32_0 : i32, i32
  }
  func.func @transform_11(%arg0: i32) -> (i32, i32) {
    %c0_i32 = arith.constant 0 : i32
    %c0_i32_0 = arith.constant 0 : i32
    %c0_i32_1 = arith.constant 0 : i32
    return %c0_i32, %c0_i32_0 : i32, i32
  }
  func.func @transform_12(%arg0: i32) -> (i32, i32) {
    %c0_i32 = arith.constant 0 : i32
    %c0_i32_0 = arith.constant 0 : i32
    %c0_i32_1 = arith.constant 0 : i32
    return %c0_i32, %c0_i32_0 : i32, i32
  }
  func.func @transform_13(%arg0: i32) -> (i32, i32) {
    %c0_i32 = arith.constant 0 : i32
    %c0_i32_0 = arith.constant 0 : i32
    %c0_i32_1 = arith.constant 0 : i32
    return %c0_i32, %c0_i32_0 : i32, i32
  }
  func.func @transform_14(%arg0: i32) -> (i32, i32) {
    %c0_i32 = arith.constant 0 : i32
    %c0_i32_0 = arith.constant 0 : i32
    %c0_i32_1 = arith.constant 0 : i32
    return %c0_i32, %c0_i32_0 : i32, i32
  }
  func.func @transform_15(%arg0: i32) -> (i32, i32) {
    %c0_i32 = arith.constant 0 : i32
    %c0_i32_0 = arith.constant 0 : i32
    %c0_i32_1 = arith.constant 0 : i32
    return %c0_i32, %c0_i32_0 : i32, i32
  }
  func.func @transform_16(%arg0: i32) -> (i32, i32) {
    %c0_i32 = arith.constant 0 : i32
    %c0_i32_0 = arith.constant 0 : i32
    %c0_i32_1 = arith.constant 0 : i32
    return %c0_i32, %c0_i32_0 : i32, i32
  }
  func.func @transform_17(%arg0: i32) -> (i32, i32) {
    %c0_i32 = arith.constant 0 : i32
    %c0_i32_0 = arith.constant 0 : i32
    %c0_i32_1 = arith.constant 0 : i32
    return %c0_i32, %c0_i32_0 : i32, i32
  }
  func.func @transform_18(%arg0: i32) -> (i32, i32) {
    %c0_i32 = arith.constant 0 : i32
    %c0_i32_0 = arith.constant 0 : i32
    %c0_i32_1 = arith.constant 0 : i32
    return %c0_i32, %c0_i32_0 : i32, i32
  }
  func.func @transform_19(%arg0: i32) -> (i32, i32) {
    %c0_i32 = arith.constant 0 : i32
    %c0_i32_0 = arith.constant 0 : i32
    %c0_i32_1 = arith.constant 0 : i32
    return %c0_i32, %c0_i32_0 : i32, i32
  }
  func.func @transform_20(%arg0: i32) -> (i32, i32, i32) {
    %c0_i32 = arith.constant 0 : i32
    %c0_i32_0 = arith.constant 0 : i32
    %c0_i32_1 = arith.constant 0 : i32
    return %arg0, %c0_i32, %c0_i32_0 : i32, i32, i32
  }
}

</mosaic_0001>

<bundles_post_ra>
// kernel: tpu_custom_call.1
= control target key start
LH: loop header
LB: loop body
LE: loop exit
PB: predicated region body
PF: predicated region fallthrough
CT: control target
= control target key end

     0   :  { %s4441_s0 = inlined_call_operand.vmem [shape: f32[2,16,32], index: 0, kind: input, shape index: {}]   ;;  %s4442_s1 = inlined_call_operand.hbm [shape: f32[2,8,32], index: 1, kind: input, shape index: {}]   ;;  %s4443_s2 = inlined_call_operand.vmem [shape: f32[2,16,32], index: 2, kind: input, shape index: {}]   ;;  %s4444_s3 = inlined_call_operand.hbm [shape: f32[2,8,32], index: 3, kind: input, shape index: {}]   ;;  %s4445_s4 = inlined_call_operand.hbm [shape: f32[2,1,16], index: 4, kind: input, shape index: {}]   ;;  %s4446_s5 = inlined_call_operand.hbm [shape: f32[2,1,8], index: 5, kind: input, shape index: {}]   ;;  %s4447_s6 = inlined_call_operand.vmem [shape: f32[32,96], index: 6, kind: input, shape index: {}]   ;;  %s4448_s7 = inlined_call_operand.vmem [shape: f32[1,96], index: 7, kind: input, shape index: {}]   ;;  %s4449_s8 = inlined_call_operand.hbm [shape: f32[32,32], index: 8, kind: input, shape index: {}]   ;;  %s4450_s9 = inlined_call_operand.hbm [shape: f32[1,32], index: 9, kind: input, shape index: {}]   ;;  %s4451_s10 = inlined_call_operand.hbm [shape: f32[32,96], index: 10, kind: input, shape index: {}]   ;;  %s4452_s11 = inlined_call_operand.hbm [shape: f32[1,96], index: 11, kind: input, shape index: {}]   ;;  %s4453_s12 = inlined_call_operand.hbm [shape: f32[32,32], index: 12, kind: input, shape index: {}]   ;;  %s4454_s13 = inlined_call_operand.vmem [shape: f32[1,32], index: 13, kind: input, shape index: {}]   ;;  %s4455_s14 = inlined_call_operand.hbm [shape: f32[32,64], index: 14, kind: input, shape index: {}]   ;;  %s4456_s15 = inlined_call_operand.vmem [shape: f32[1,64], index: 15, kind: input, shape index: {}]   ;;  %s4457_s16 = inlined_call_operand.vmem [shape: f32[64,32], index: 16, kind: input, shape index: {}]   ;;  %s4458_s17 = inlined_call_operand.vmem [shape: f32[1,32], index: 17, kind: input, shape index: {}]   ;;  %s4459_s18 = inlined_call_operand.vmem [shape: f32[3,32], index: 18, kind: input, shape index: {}]   ;;  %s4460_s19 = inlined_call_operand.vmem [shape: f32[3,32], index: 19, kind: input, shape index: {}]   ;;  %s4461_s20 = inlined_call_operand.hbm [shape: f32[2,16,32], index: 20, kind: output, shape index: {}]  }
   0x1   :  { %4483 = sst [smem:[#allocation34_spill]] %s4441_s0 }
   0x2   :  { %4484 = sst [smem:[#allocation35_spill]] %s4442_s1 }
   0x3   :  { %4485 = sst [smem:[#allocation36_spill]] %s4443_s2 }
   0x4   :  { %4486 = sst [smem:[#allocation37_spill]] %s4444_s3 }
   0x5   :  { %4487 = sst [smem:[#allocation38_spill]] %s4445_s4 }
   0x6   :  { %4488 = sst [smem:[#allocation39_spill]] %s4449_s8 }
   0x7   :  { %4489 = sst [smem:[#allocation40_spill]] %s4450_s9 }
   0x8   :  { %4490 = sst [smem:[#allocation41_spill]] %s4451_s10 }
   0x9   :  { %4491 = sst [smem:[#allocation42_spill]] %s4452_s11 }
   0xa   :  { %4492 = sst [smem:[#allocation43_spill]] %s4453_s12 }
   0xb   :  { %4493 = sst [smem:[#allocation44_spill]] %s4455_s14 }
   0xc   :  { %4494 = sst [smem:[#allocation45_spill]] %s4456_s15 }
   0xd   :  { %4495 = sst [smem:[#allocation46_spill]] %s4457_s16 }
   0xe   :  { %4496 = sst [smem:[#allocation47_spill]] %s4458_s17 }
   0xf   :  { %4497 = sst [smem:[#allocation48_spill]] %s4461_s20 }
  0x10   :  { %25 = vsyncpa [#allocation3], 0 }
  0x11   :  { %27 = vsyncpa [#allocation3 + $0x1], 0 }
  0x12   :  { %28 = vsyncpa [#allocation6], 0 }
  0x13   :  { %30 = vsyncpa [#allocation6 + $0x1], 0 }
  0x14   :  { %31 = vsyncpa [#allocation9], 0 }
  0x15   :  { %33 = vsyncpa [#allocation9 + $0x1], 0 }
  0x16   :  { %34 = vsyncpa [#allocation12], 0 }
  0x17   :  { %35 = vsyncpa [#allocation15], 0 }
  0x18   :  { %36 = vsyncpa [#allocation18], 0 }
  0x19   :  { %37 = vsyncpa [#allocation4], 0 }
  0x1a   :  { %39 = vsyncpa [#allocation4 + $0x1], 0  ;;  %s3758_s1 = smov 0   ;;  %s3760_s22 = smov 0  }
  0x1b   :  { %s3762_s23 = smov 0   ;;  %s3764_s24 = smov 0  }
  0x1c LB: > { %4498 = sst [smem:[#allocation28_spill]] %s3623_s1  ;;  %s3782_s26 = sadd.s32 4294967295, %s3635_s24   ;;  %s3635_s24 = sphi %s3764_s24, %s4542_s24   ;;  %s3631_s23 = sphi %s3762_s23, %s4544_s23   ;;  %s3627_s22 = sphi %s3760_s22, %s4546_s22   ;;  %s3623_s1 = sphi %s3758_s1, %s4545_s1  }
  0x1d   : > { %4499 = sst [smem:[#allocation29_spill]] %s3631_s23  ;;  %p2858_p0 = scmp.ge.s32.totalorder %s3635_s24, 1 }
  0x1e   : > { %s4500_s8 = sld [smem:[#allocation39_spill]]  ;;  %p4478_p1 = scmp.eq.s32.totalorder %s3782_s26, 0 }
  0x1f   : > { %p526_p2 = scmp.lt.s32.totalorder %s3635_s24, 3  ;;  %s3637_s28 = smov [#allocation10]  }
  0x20   : > { %s545_s4 = sshll.u32 %s3637_s28, 4  ;;  %s4502_s9 = sld [smem:[#allocation40_spill]]  ;;  %s546_s4 = int_to_ptr.vmem [resolvable:$true] %s545_s4 }
  0x21   : > { %p3787_p3 = pnand %p2858_p0, %p526_p2  ;;  %s4504_s11 = sld [smem:[#allocation42_spill]] }
  0x22   : > { %s4466_s30 = smov 128   ;;  %s3641_s2 = smov [#allocation14]  }
  0x23   : > { %p3000_p4 = pneg %p3787_p3  ;;  %s586_s25 = sshll.u32 %s3641_s2, 4  ;;  %s587_s25 = int_to_ptr.vmem [resolvable:$true] %s586_s25 }
  0x24   : > { %s543_s3 = sshll.u32 %s4500_s8, 4  ;;  %s3638_s8 = smov [#allocation11]   ;;  %s544_s3 = int_to_ptr.hbm [resolvable:$true] %s543_s3 }
  0x25   : > { %p3799_p6 = pnand %p3000_p4, %p4478_p1  ;;  %s560_s29 = sshll.u32 %s3638_s8, 4  ;;  %s561_s29 = int_to_ptr.vmem [resolvable:$true] %s560_s29 }
  0x26   : > { %s558_s0 = sshll.u32 %s4502_s9, 4  ;;  %s4468_s9 = smov 8   ;;  %s559_s0 = int_to_ptr.hbm [resolvable:$true] %s558_s0 }
  0x27   : > { %s584_s28 = sshll.u32 %s4504_s11, 4  ;;  %s2857_s8 = sadd.s32 4294967294, %s3635_s24   ;;  %s585_s28 = int_to_ptr.hbm [resolvable:$true] %s584_s28 }
  0x28   : > { %3003 = dma.hbm_to_vmem [thread:$0]  (!%p3799_p6), %s544_s3, 512, %s546_s4, [#allocation9], %s4466_s30, %s4466_s30, %s4468_s9  }
  0x29   : > { %3006 = dma.hbm_to_vmem [thread:$0]  (!%p3799_p6), %s559_s0, 16, %s561_s29, [#allocation12]  }
  0x2a   : > { %3012 = dma.hbm_to_vmem [thread:$0]  (!%p3799_p6), %s585_s28, 16, %s587_s25, [#allocation15]  }
  0x2b   : > { %s3817_s11 = sadd.s32 1, %s3635_s24   ;;  %s78_s20 = sadd.s32 1, %s3631_s23 }
  0x2c   : > { %4505 = sst [smem:[#allocation30_spill]] %s3817_s11  ;;  %s75_s3 = ssub.s32 %s3635_s24, %s3817_s11 }
  0x2d   : > { %p85_p7 = scmp.ne.s32.totalorder %s3631_s23, %s3627_s22  ;;  %p76_p8 = scmp.eq.s32.totalorder %s75_s3, 0 }
  0x2e   : > { %p86_p9 = scmp.eq.s32.totalorder %s3635_s24, 0  ;;  %p91_p10 = scmp.ne.s32.totalorder %s3627_s22, %s3623_s1 }
  0x2f   : > { %p513_p11 = scmp.eq.s32.totalorder %s3782_s26, 1  ;;  %p519_p2 = scmp.eq.s32.totalorder %s2857_s8, 1 }
  0x30   : > { %s3829_s4 = scalar_select %p76_p8, %s3631_s23, %s78_s20  }
  0x31   : > { %p87_p12 = por %p86_p9, %p85_p7  ;;  %p3833_p13 = por %p4478_p1, %p91_p10 }
  0x32   : > { %4506 = sst [smem:[#allocation31_spill]] %s3829_s4  ;;  %p3837_p0 = por %p513_p11, %p85_p7 }
  0x33   : > { %p3042_p4 = scmp.lt.s32.totalorder %s3635_s24, 2  ;;  %s3843_s29 = sand.u32 1, %s3631_s23  }
  0x34   : > { %s4508_s28 = scalar_select %p3837_p0, 1, 0 }
  0x35   : > { %p3845_p5 = por %p519_p2, %p91_p10  ;;  %s4477_s2 = sshll.u32 %s3843_s29, 3 }
  0x36   : > { %4509 = sst [smem:[#allocation32_spill]] %s4508_s28  ;;  %s4480_s25 = sshll.u32 %s3635_s24, 3 }
  0x37   : > { %s4510_s20 = scalar_select %p3845_p5, 1, 0 }
  0x38   : > { %p3851_p8 = pnand %p3042_p4, %p87_p12  ;;  %s4479_s30 = sand.u32 1, %s3635_s24  }
  0x39   : > { %4511 = sst [smem:[#allocation33_spill]] %s4510_s20  ;;  %s682_s11 = scalar_lea.vmem [#allocation5], %s4477_s2 }
  0x3a   : > { %s4513_s4 = sld [smem:[#allocation37_spill]]  ;;  %s690_s1 = sshll.u32 %s682_s11, 4  ;;  %s691_s1 = int_to_ptr.vmem [resolvable:$true] %s690_s1 }
  0x3b   : > { %s3865_s20 = scalar_lea.sflag [#allocation6], %s4479_s30  ;;  %p3339_p9 = pneg %p3851_p8 }
  0x40   : > { %s686_s23 = scalar_lea.hbm %s4513_s4, %s4480_s25  ;;  %s3342_s11 = scalar_lea.hbm %s4513_s4, 16 }
  0x41   : > { %s688_s28 = sshll.u32 %s686_s23, 4  ;;  %s689_s28 = int_to_ptr.hbm [resolvable:$true] %s688_s28 }
  0x42   : > { %s3335_s17 = sshra.s32 %s689_s28, 4  ;;  %s3336_s17 = int_to_ptr.hbm [resolvable:$true] %s3335_s17 }
  0x43   : > { %s3337_s15 = scalar_lea.hbm %s3336_s17, 8  ;;  %p3343_p12 = scmp.lt.s32.totalorder %s3336_s17, %s4513_s4 }
  0x44   : > { %p3338_p7 = scmp.ne.s32.totalorder %s3336_s17, %s3337_s15  ;;  %p3344_p2 = scmp.lt.s32.totalorder %s3342_s11, %s3337_s15 }
  0x46   : > { %p3340_p10 = pnand %p3339_p9, %p3338_p7  ;;  %p3345_p4 = por %p3344_p2, %p3343_p12 }
  0x48   : > { %p3341_p11 = pneg %p3340_p10 }
  0x4a   : > { %p3346_p1 = pnand %p3345_p4, %p3341_p11 }
  0x4c   : > { %3349 = shalt.err (!%p3346_p1)
}
  0x4d   : > { %3025 = dma.hbm_to_vmem [thread:$0]  (!%p3851_p8), %s689_s28, 128, %s691_s1, %s3865_s20  }
  0x4e   : > { %s4514_s10 = sld [smem:[#allocation41_spill]]  ;;  %s3642_s9 = smov [#allocation13]  }
  0x4f   : > { %s571_s2 = sshll.u32 %s3642_s9, 4  ;;  %s4515_s12 = sld [smem:[#allocation43_spill]]  ;;  %s572_s2 = int_to_ptr.vmem [resolvable:$true] %s571_s2 }
  0x50   : > { %s4516_s11 = smov 8   ;;  %s4517_s23 = smov 128  }
  0x51   : > { %s3643_s1 = smov [#allocation16]   ;;  %s4518_s14 = sld [smem:[#allocation44_spill]] }
  0x52   : > { %s597_s30 = sshll.u32 %s3643_s1, 4  ;;  %s3644_s9 = smov [#allocation17]   ;;  %s598_s30 = int_to_ptr.vmem [resolvable:$true] %s597_s30 }
  0x53   : > { %s614_s15 = sshll.u32 %s3644_s9, 4  ;;  %s4521_s25 = sshll.u32 %s3843_s29, 3  ;;  %s615_s15 = int_to_ptr.vmem [resolvable:$true] %s614_s15 }
  0x54   : > { %s569_s16 = sshll.u32 %s4514_s10, 4  ;;  %s4520_s10 = sld [smem:[#allocation35_spill]]  ;;  %s570_s16 = int_to_ptr.hbm [resolvable:$true] %s569_s16 }
  0x55   : > { %s595_s8 = sshll.u32 %s4515_s12, 4  ;;  %s655_s12 = scalar_lea.vmem [#allocation2], %s4521_s25  ;;  %s596_s8 = int_to_ptr.hbm [resolvable:$true] %s595_s8 }
  0x56   : > { %3009 = dma.hbm_to_vmem [thread:$0]  (!%p3799_p6), %s570_s16, 512, %s572_s2, [#allocation12], %s4517_s23, %s4517_s23, %s4516_s11  }
  0x57   : > { %s612_s4 = sshll.u32 %s4518_s14, 4  ;;  %s4519_s16 = sshll.u32 %s3635_s24, 3  ;;  %s613_s4 = int_to_ptr.hbm [resolvable:$true] %s612_s4 }
  0x58   : > { %3015 = dma.hbm_to_vmem [thread:$0]  (!%p3799_p6), %s596_s8, 512, %s598_s30, [#allocation15], %s4517_s23, %s4517_s23, %s4516_s11  }
  0x59   : > { %3018 = dma.hbm_to_vmem [thread:$0]  (!%p3799_p6), %s613_s4, 512, %s615_s15, [#allocation18], %s4517_s23, %s4517_s23, %s4516_s11  }
  0x5a   : > { %s659_s1 = scalar_lea.hbm %s4520_s10, %s4519_s16  ;;  %s663_s14 = sshll.u32 %s655_s12, 4  ;;  %s664_s14 = int_to_ptr.vmem [resolvable:$true] %s663_s14 }
  0x5b   : > { %s661_s28 = sshll.u32 %s659_s1, 4  ;;  %s652_s8 = scalar_lea.sflag [#allocation3], %s3843_s29  ;;  %s662_s28 = int_to_ptr.hbm [resolvable:$true] %s661_s28 }
  0x5c   : > { %s3455_s30 = sshra.s32 %s662_s28, 4  ;;  %s3462_s2 = scalar_lea.hbm %s4520_s10, 16  ;;  %s3456_s30 = int_to_ptr.hbm [resolvable:$true] %s3455_s30 }
  0x5d   : > { %s3457_s9 = scalar_lea.hbm %s3456_s30, 8  ;;  %p3463_p6 = scmp.lt.s32.totalorder %s3456_s30, %s4520_s10 }
  0x5e   : > { %p3458_p1 = scmp.ne.s32.totalorder %s3456_s30, %s3457_s9  ;;  %p3464_p11 = scmp.lt.s32.totalorder %s3462_s2, %s3457_s9 }
  0x60   : > { %p3460_p7 = pnand %p3458_p1, %p3339_p9  ;;  %p3465_p12 = por %p3464_p11, %p3463_p6 }
  0x62   : > { %p3461_p10 = pneg %p3460_p7 }
  0x64   : > { %p3466_p2 = pnand %p3465_p12, %p3461_p10 }
  0x66   : > { %3469 = shalt.err (!%p3466_p2)
}
  0x67   : > { %3022 = dma.hbm_to_vmem [thread:$0]  (!%p3851_p8), %s662_s28, 128, %s664_s14, %s652_s8  }
  0x68   : > { %s4522_s15 = sld [smem:[#allocation38_spill]]  ;;  %s700_s25 = scalar_lea.vmem [#allocation7], %s3843_s29 }
  0x69   : > { %s707_s21 = sshll.u32 %s700_s25, 4  ;;  %s708_s21 = int_to_ptr.vmem [resolvable:$true] %s707_s21 }
  0x6e   : > { %s703_s17 = scalar_lea.hbm %s4522_s15, %s3635_s24  ;;  %s3492_s14 = scalar_lea.hbm %s4522_s15, 2 }
  0x6f   : > { %s705_s1 = sshll.u32 %s703_s17, 4  ;;  %s706_s1 = int_to_ptr.hbm [resolvable:$true] %s705_s1 }
  0x70   : > { %s3485_s30 = sshra.s32 %s706_s1, 4  ;;  %s3486_s30 = int_to_ptr.hbm [resolvable:$true] %s3485_s30 }
  0x71   : > { %s3487_s9 = scalar_lea.hbm %s3486_s30, 1  ;;  %p3493_p10 = scmp.lt.s32.totalorder %s3486_s30, %s4522_s15 }
  0x72   : > { %p3488_p4 = scmp.ne.s32.totalorder %s3486_s30, %s3487_s9  ;;  %p3494_p6 = scmp.lt.s32.totalorder %s3492_s14, %s3487_s9 }
  0x74   : > { %p3490_p1 = pnand %p3488_p4, %p3339_p9  ;;  %p3495_p11 = por %p3494_p6, %p3493_p10 }
  0x76   : > { %p3491_p7 = pneg %p3490_p1 }
  0x78   : > { %p3496_p12 = pnand %p3495_p11, %p3491_p7 }
  0x7a   : > { %3499 = shalt.err (!%p3496_p12)
}
  0x7b   : > { %3028 = dma.hbm_to_vmem [thread:$0]  (!%p3851_p8), %s706_s1, 16, %s708_s21, %s3865_s20  }
  0x7c   : > { %s720_s12 = scalar_lea.hbm %s4446_s5, %s3635_s24  ;;  %s717_s17 = scalar_lea.vmem [#allocation8], %s3843_s29 }
  0x7d   : > { %s722_s23 = sshll.u32 %s720_s12, 4  ;;  %s724_s25 = sshll.u32 %s717_s17, 4  ;;  %s723_s23 = int_to_ptr.hbm [resolvable:$true] %s722_s23  ;;  %s725_s25 = int_to_ptr.vmem [resolvable:$true] %s724_s25 }
  0x7e   : > { %s4523_s30 = sand.u32 1, %s3635_s24   ;;  %s3515_s16 = sshra.s32 %s723_s23, 4  ;;  %s3516_s16 = int_to_ptr.hbm [resolvable:$true] %s3515_s16 }
  0x7f   : > { %s715_s9 = scalar_lea.sflag [#allocation9], %s4523_s30  ;;  %s3517_s2 = scalar_lea.hbm %s3516_s16, 1 }
  0x80   : > { %p3518_p2 = scmp.ne.s32.totalorder %s3516_s16, %s3517_s2  ;;  %s3522_s21 = scalar_lea.hbm %s4446_s5, 2 }
  0x81   : > { %p3523_p7 = scmp.lt.s32.totalorder %s3516_s16, %s4446_s5  ;;  %p3524_p10 = scmp.lt.s32.totalorder %s3522_s21, %s3517_s2 }
  0x82   : > { %p3520_p4 = pnand %p3518_p2, %p3339_p9 }
  0x83   : > { %p3525_p6 = por %p3524_p10, %p3523_p7 }
  0x84   : > { %p3521_p1 = pneg %p3520_p4 }
  0x86   : > { %p3526_p11 = pnand %p3525_p6, %p3521_p1 }
  0x88   : > { %3529 = shalt.err (!%p3526_p11)
}
  0x89   : > { %3031 = dma.hbm_to_vmem [thread:$0]  (!%p3851_p8), %s723_s23, 16, %s725_s25, %s715_s9  }
  0x8a   : > { %733 = sbr.rel (%p3787_p3) target bundleno = 4100 (0x1004), region = 100  ;;  %s3962_s29 = sand.u32 (!%p3787_p3), 1, %s3627_s22  }
  0x8b   : > { %s2871_s8 = sshll.u32 (!%p3787_p3), %s3962_s29, 3  ;;  %s736_s4 = scalar_lea.sflag (!%p3787_p3), [#allocation3], %s3962_s29 }
  0x8c   : > { %s3966_s11 = scalar_lea.vmem (!%p3787_p3), [#allocation2], %s2871_s8 }
  0x8f   : > { %3590 = dma.done.wait (%p3833_p13), %s736_s4, 128  }
  0x90   : > { %3592 = vsyncadd (%p3833_p13), %s736_s4, 4294967168  ;;  %s745_s3 = sand.u32 1, %s3782_s26   ;;  %s3973_s12 = scalar_lea.vmem [#allocation5], %s2871_s8 }
  0x91   : > { %s746_s27 = scalar_lea.sflag [#allocation6], %s745_s3 }
  0x92   : > { %3594 = dma.done.wait (%p3833_p13), %s746_s27, 144  }
  0x93   : > { %3596 = vsyncadd (%p3833_p13), %s746_s27, 4294967152  ;;  %s758_s23 = scalar_lea.vmem [#allocation7], %s3962_s29  ;;  %s765_s17 = scalar_lea.sflag [#allocation9], %s745_s3 }
  0x94   : > { %s767_s25 = scalar_lea.vmem [#allocation8], %s3962_s29 }
  0x95   : > { %3598 = dma.done.wait (%p3833_p13), %s765_s17, 16  }
  0x96   : > { %3600 = vsyncadd (%p3833_p13), %s765_s17, 4294967280  ;;  %p4524_p3 = scmp.eq.s32.totalorder %s3782_s26, 0 }
  0x98   : > { %3602 = dma.done.wait (%p4524_p3), [#allocation9], 512   ;;  %p4525_p8 = pmov %p4524_p3 }
  0x99   : > { %p4526_p9 = pmov %p4524_p3 }
  0x9a   : > { %3604 = vsyncadd (%p4525_p8), [#allocation9], 4294966784 }
  0x9b   : > { %3606 = dma.done.wait (%p4526_p9), [#allocation12], 528   ;;  %p4527_p12 = pmov %p4524_p3 }
  0x9c   : > { %p4528_p2 = pmov %p4524_p3 }
  0x9d   : > { %3608 = vsyncadd (%p4527_p12), [#allocation12], 4294966768 }
  0x9e   : > { %3610 = dma.done.wait (%p4528_p2), [#allocation15], 528   ;;  %p4529_p4 = pmov %p4528_p2 }
  0x9f   : > { %p4530_p13 = pmov %p4528_p2 }
  0xa0   : > { %3612 = vsyncadd (%p4529_p4), [#allocation15], 4294966768 }
  0xa1   : > { %3614 = dma.done.wait (%p4530_p13), [#allocation18], 512   ;;  %p4531_p1 = pmov %p4528_p2 }
  0xa2   : > { %v900_v0 = vld [vmem:[%s4447_s6 + $0x10] sm:$0xff]  ;;  %v901_v1 = vld [vmem:[%s4447_s6 + $0x18] sm:$0xff]  ;;  %v898_v3 = vld [vmem:[%s4447_s6] sm:$0xff]  ;;  %s3645_s14 = smov 96   ;;  %p878_p7 = scmp.lt.s32.totalorder %s3782_s26, 1  ;;  %vm911_vm0 = vcmask 261120  }
  0xa3   : > { %3616 = vsyncadd (%p4531_p1), [#allocation18], 4294966784  ;;  %v3098_v2 = vpack.i.bf16 %v900_v0, %v901_v1  ;;  %930 = vmatpush.msra.mxu0 %v901_v1  ;;  %v899_v4 = vld [vmem:[%s4447_s6 + $0x8] sm:$0xff]  ;;  %s4532_s27 = sld [smem:[#allocation34_spill]]  ;;  %v4039_v12 = vld [vmem:[%s4448_s7] ss:$0 sm:$0xff] }
  0xa4   : > { %v3103_v5 = vpack.i.bf16 %v898_v3, %v899_v4  ;;  %s879_s28 = scalar_select %p878_p7, %s3782_s26, 1  ;;  %957 = vrot.lane.b32.xlu1 %v4039_v12, %s3645_s14  ;;  %vm1027_vm1 = vcmask 64512   ;;  %v4056_v28 = vld [vmem:[%s758_s23] ss:$0 sm:$0xff]  ;;  %vm1070_vm2 = vcmask 130048  }
  0xa5   : > { %3099 = vrot.lane.b32.xlu0 %v3098_v2, %s3645_s14  ;;  %931 = vmatpush.msra.mxu0 %v900_v0  ;;  %s4533_s9 = sld [smem:[#allocation36_spill]]  ;;  %s3646_s1 = smov 64  }
  0xa6   : > { %s2963_s8 = sshll.u32 %s879_s28, 4  ;;  %3114 = vrot.lane.b32.xlu2 %v3103_v5, %s3646_s1  ;;  %s3647_s23 = smov 120  }
  0xa7   : > { %932 = vmatpush.msra.mxu0 %v899_v4  ;;  %s3648_s21 = smov 112   ;;  %s3649_s28 = smov 104  }
  0xa8   : > { %s4536_s20 = sld [smem:[#allocation47_spill]] }
  0xa9   : > { %933 = vmatpush.msra.mxu0 %v898_v3  ;;  %s882_s17 = scalar_lea.vmem %s4532_s27, %s2963_s8 }
  0xaa   : > { %v4023_v6 = vld [vmem:[%s882_s17] sm:$0xff]  ;;  %v4030_v9 = vld [vmem:[%s882_s17 + $0x8] sm:$0xff]  ;;  %s4534_s17 = sld [smem:[#allocation46_spill]] }
  0xab   : > { %s887_s16 = scalar_lea.vmem %s4533_s9, %s2963_s8  ;;  %s4535_s9 = sld [smem:[#allocation45_spill]] }
  0xac   : > { %v4025_v7 = vld [vmem:[%s887_s16] sm:$0xff]  ;;  %v4032_v10 = vld [vmem:[%s887_s16 + $0x8] sm:$0xff]  ;;  %3109 = vrot.lane.b32.xlu1 %v3098_v2, %s3646_s1  ;;  %s2965_s8 = sshll.u32 %s3782_s26, 4  ;;  %s2630_s26 = scalar_lea.sflag [#allocation4], %s3962_s29 }
  0xad   : > { %3104 = vrot.lane.b32.xlu0 %v3103_v5, %s3645_s14  ;;  %v896_v8 = vadd.f32 %v4025_v7, %v4023_v6  ;;  %v897_v11 = vadd.f32 %v4032_v10, %v4030_v9 }
  0xaf   : > { %2884 = vmatmul.msk.f32.vlgmr.msra.gmra.mxu0 %vm911_vm0, %v896_v8 }
  0xb7   : > { %2885 = vmatmul.msk.f32.gmra.mxu0 %vm911_vm0, %v897_v11 }
 0x100   : > { %v3115_v38 = vpop.permute.xlu2 %3114 }
 0x101   : > { %v3116_v41 = vunpack.i.l.bf16 %v3115_v38  ;;  %v3117_v42 = vunpack.i.h.bf16 %v3115_v38 }
 0x116   : > { %v958_v20 = vpop.permute.xlu1 %957 }
 0x117   : > { %v3100_v13 = vpop.permute.xlu0 %3099 }
 0x118   : > { %v3101_v14 = vunpack.i.l.bf16 %v3100_v13  ;;  %v3102_v15 = vunpack.i.h.bf16 %v3100_v13 }
 0x11a   : > { %972 = vmatpush.msra.mxu1 %v3101_v14 }
 0x11c   : > { %973 = vmatpush.msra.mxu1 %v3102_v15 }
 0x11e   : > { %v3110_v37 = vpop.permute.xlu1 %3109 }
 0x11f   : > { %v3105_v16 = vpop.permute.xlu0 %3104  ;;  %v3111_v39 = vunpack.i.l.bf16 %v3110_v37  ;;  %v3112_v40 = vunpack.i.h.bf16 %v3110_v37 }
 0x120   : > { %v3106_v17 = vunpack.i.l.bf16 %v3105_v16  ;;  %v3107_v18 = vunpack.i.h.bf16 %v3105_v16 }
 0x121   : > { %1016 = vmatpush.msra.mxu2 %v3111_v39 }
 0x122   : > { %974 = vmatpush.msra.mxu1 %v3106_v17 }
 0x123   : > { %1017 = vmatpush.msra.mxu2 %v3112_v40 }
 0x124   : > { %975 = vmatpush.msra.mxu1 %v3107_v18 }
 0x125   : > { %2886 = vmatmul.msk.f32.vlgmr.msra.gmra.mxu1 %vm911_vm0, %v896_v8  ;;  %1018 = vmatpush.msra.mxu2 %v3116_v41 }
 0x127   : > { %1019 = vmatpush.msra.mxu2 %v3117_v42 }
 0x128   : > { %2888 = vmatmul.msk.f32.vlgmr.msra.gmra.mxu2 %vm911_vm0, %v4023_v6 }
 0x12c   : > { %v935_v23 = vpop.f32.mrf.mxu0 }
 0x12d   : > { %2887 = vmatmul.msk.f32.gmra.mxu1 %vm911_vm0, %v897_v11  ;;  %v936_v25 = vadd.f32 %v4039_v12, %v935_v23 }
 0x130   : > { %2889 = vmatmul.msk.f32.gmra.mxu2 %vm911_vm0, %v4030_v9 }
 0x134   : > { %v938_v26 = vpop.f32.mrf.mxu0 }
 0x135   : > { %v939_v27 = vadd.f32 %v4039_v12, %v938_v26 }
 0x1a2   : > { %v977_v19 = vpop.f32.mrf.mxu1 }
 0x1a3   : > { %v978_v24 = vadd.f32 %v977_v19, %v958_v20  ;;  %v903_v19 = vld [vmem:[#allocation10] sm:$0xff] }
 0x1aa   : > { %v980_v21 = vpop.f32.mrf.mxu1 }
 0x1ab   : > { %v981_v22 = vadd.f32 %v980_v21, %v958_v20  ;;  %v1021_v55 = vpop.f32.mrf.mxu2 }
 0x1ad   : > { %2890 = vmatpush.xpose.msk.msra.mxu3 %vm1027_vm1, %v981_v22 }
 0x1b1   : > { %2891 = vmatpush.xpose.msk.msra.mxu3 %vm1027_vm1, %v978_v24 }
 0x1b3   : > { %v1024_v0 = vpop.f32.mrf.mxu2 }
 0x1b4   : > { %2892 = vmatmul.msk.f32.vlgmr.msra.gmra.mxu3 %vm1027_vm1, %v936_v25 }
 0x1bc   : > { %2893 = vmatmul.msk.f32.gmra.mxu3 %vm1027_vm1, %v939_v27 }
 0x237   : > { %v1057_v29 = vpop.f32.mrf.mxu3 }
 0x238   : > { %v1063_v30 = vmul.f32 0.35355338, %v1057_v29 }
 0x23a   : > { %v1068_v31 = vadd.f32 %v4056_v28, %v1063_v30 }
 0x23c   : > { %v1071_v32 = vsel %vm1070_vm2, %v1068_v31, -inf }
 0x23d   : > { %1072 = vmax.xlane.f32.xlu2 %v1071_v32 }
 0x23f   : > { %v1060_v33 = vpop.f32.mrf.mxu3 }
 0x240   : > { %v1064_v34 = vmul.f32 0.35355338, %v1060_v33 }
 0x242   : > { %v1069_v35 = vadd.f32 %v4056_v28, %v1064_v34 }
 0x244   : > { %v1074_v36 = vsel %vm1070_vm2, %v1069_v35, -inf }
 0x245   : > { %1075 = vmax.xlane.f32.xlu0 %v1074_v36 }
 0x259   : > { %1154 = vrot.lane.b32.xlu0 %v981_v22, %s3647_s23 }
 0x261   : > { %1148 = vrot.lane.b32.xlu0 %v936_v25, %s3647_s23 }
 0x269   : > { %1338 = vrot.lane.b32.xlu0 %v978_v24, %s3648_s21 }
 0x271   : > { %1495 = vrot.lane.b32.xlu0 %v978_v24, %s3649_s28 }
 0x279   : > { %1493 = vrot.lane.b32.xlu0 %v939_v27, %s3649_s28 }
 0x2b0   : > { %v1073_v43 = vpop.xlane.xlu2 %1072 }
 0x2b1   : > { %v1077_v44 = vsub.f32 %v1068_v31, %v1073_v43 }
 0x2b3   : > { %v1079_v45 = vmul.f32 1.442695, %v1077_v44 }
 0x2b5   : > { %3167 = vpow2.f32 %v1079_v45 }
 0x2b8   : > { %v1076_v46 = vpop.xlane.xlu0 %1075 }
 0x2b9   : > { %v1078_v47 = vsub.f32 %v1069_v35, %v1076_v46 }
 0x2bb   : > { %v3168_v48 = vpop.eup %3167  ;;  %v1081_v49 = vmul.f32 1.442695, %v1078_v47 }
 0x2bc   : > { %v1083_v50 = vsel %vm1070_vm2, %v3168_v48, 0.0 }
 0x2bd   : > { %3169 = vpow2.f32 %v1081_v49  ;;  %1084 = vadd.xlane.f32.xlu1 %v1083_v50 }
 0x2c3   : > { %v3170_v51 = vpop.eup %3169 }
 0x2c4   : > { %v1086_v52 = vsel %vm1070_vm2, %v3170_v51, 0.0 }
 0x2c5   : > { %1087 = vadd.xlane.f32.xlu2 %v1086_v52 }
 0x2cb   : > { %v1155_v53 = vpop.permute.xlu0 %1154 }
 0x2cc   : > { %2896 = vmatpush.xpose.msk.msrb.mxu1 %vm1027_vm1, %v1155_v53 }
 0x2d6   : > { %1152 = vrot.lane.b32.xlu1 %v978_v24, %s3647_s23 }
 0x2dd   : > { %995 = vrot.lane.b32.xlu2 %v4039_v12, %s3646_s1 }
 0x2de   : > { %1340 = vrot.lane.b32.xlu1 %v981_v22, %s3648_s21 }
 0x2e5   : > { %1150 = vrot.lane.b32.xlu2 %v939_v27, %s3647_s23 }
 0x2e6   : > { %1497 = vrot.lane.b32.xlu1 %v981_v22, %s3649_s28  ;;  %v1149_v22 = vpop.permute.xlu0 %1148 }
 0x2ed   : > { %1334 = vrot.lane.b32.xlu2 %v936_v25, %s3648_s21 }
 0x2ee   : > { %1491 = vrot.lane.b32.xlu1 %v936_v25, %s3649_s28  ;;  %v1339_v30 = vpop.permute.xlu0 %1338 }
 0x2f5   : > { %1336 = vrot.lane.b32.xlu2 %v939_v27, %s3648_s21 }
 0x2f6   : > { %v1496_v33 = vpop.permute.xlu0 %1495 }
 0x330   : > { %v1085_v54 = vpop.xlane.xlu1 %1084 }
 0x331   : > { %3171 = vrcp.f32 %v1085_v54  ;;  %v1100_v60 = vand.u32 2147483648, %v1085_v54  ;;  %v1098_v62 = vand.u32 2147483647, %v1085_v54  ;;  %vm1094_vm4 = vweird.f32 %v1085_v54 }
 0x333   : > { %v1101_v2 = vor.u32 1.1754944e-38, %v1100_v60  ;;  %vm1099_vm6 = vcmp.eq.f32.partialorder %v1098_v62, 8.507059e+37 }
 0x337   : > { %v3172_v56 = vpop.eup %3171 }
 0x338   : > { %v1090_v57 = vmul.f32 %v3172_v56, %v1085_v54  ;;  %v1088_v58 = vpop.xlane.xlu2 %1087  ;;  %vm1095_vm3 = vweird.f32 %v3172_v56 }
 0x339   : > { %3173 = vrcp.f32 %v1088_v58  ;;  %vm1096_vm5 = vmor %vm1094_vm4, %vm1095_vm3  ;;  %v1115_v14 = vand.u32 2147483648, %v1088_v58  ;;  %v1113_v18 = vand.u32 2147483647, %v1088_v58  ;;  %vm1109_vm8 = vweird.f32 %v1088_v58 }
 0x33a   : > { %v1091_v59 = vsub.f32 1.0, %v1090_v57 }
 0x33b   : > { %v1116_v21 = vor.u32 1.1754944e-38, %v1115_v14  ;;  %vm1114_vm10 = vcmp.eq.f32.partialorder %v1113_v18, 8.507059e+37 }
 0x33c   : > { %v1092_v61 = vmul.f32 %v3172_v56, %v1091_v59 }
 0x33e   : > { %v1093_v63 = vadd.f32 %v3172_v56, %v1092_v61 }
 0x33f   : > { %v3174_v1 = vpop.eup %3173 }
 0x340   : > { %v1105_v3 = vmul.f32 %v3174_v1, %v1088_v58  ;;  %v996_v4 = vpop.permute.xlu2 %995  ;;  %v1097_v5 = vsel %vm1096_vm5, %v3172_v56, %v1093_v63  ;;  %vm1110_vm7 = vweird.f32 %v3174_v1 }
 0x341   : > { %v1022_v8 = vadd.f32 %v1021_v55, %v996_v4  ;;  %v1025_v11 = vadd.f32 %v1024_v0, %v996_v4  ;;  %v1102_v12 = vsel %vm1099_vm6, %v1101_v2, %v1097_v5  ;;  %vm1111_vm9 = vmor %vm1109_vm8, %vm1110_vm7 }
 0x342   : > { %v1106_v13 = vsub.f32 1.0, %v1105_v3  ;;  %v1103_v17 = vmul.f32 %v3168_v48, %v1102_v12  ;;  %v1494_v48 = vpop.permute.xlu0 %1493 }
 0x343   : > { %1139 = vmatpush.msrb.mxu0 %v1025_v11  ;;  %v4083_v15 = vpack.i.bf16 %v1022_v8, %v1025_v11 }
 0x344   : > { %v1107_v16 = vmul.f32 %v3174_v1, %v1106_v13 }
 0x345   : > { %1140 = vmatpush.msrb.mxu0 %v1022_v8 }
 0x346   : > { %2894 = vmatmul.msk.f32.vlgmr.msrb.gmra.mxu0 %vm1070_vm2, %v1103_v17  ;;  %v1108_v20 = vadd.f32 %v3174_v1, %v1107_v16 }
 0x347   : > { %1326 = vmatpush.msra.mxu0 %v903_v19 }
 0x348   : > { %v1153_v23 = vpop.permute.xlu1 %1152  ;;  %v1112_v24 = vsel %vm1111_vm9, %v3174_v1, %v1108_v20  ;;  %v1151_v27 = vpop.permute.xlu2 %1150 }
 0x349   : > { %2897 = vmatpush.xpose.msk.msrb.mxu1 %vm1027_vm1, %v1153_v23  ;;  %v1117_v25 = vsel %vm1114_vm10, %v1116_v21, %v1112_v24 }
 0x34a   : > { %v1118_v26 = vmul.f32 %v3170_v51, %v1117_v25 }
 0x34c   : > { %2898 = vmatmul.msk.f32.vlgmr.msrb.gmra.mxu1 %vm1027_vm1, %v1149_v22 }
 0x34e   : > { %2895 = vmatmul.msk.f32.gmra.mxu0 %vm1070_vm2, %v1118_v26 }
 0x350   : > { %v1341_v29 = vpop.permute.xlu1 %1340  ;;  %v1335_v32 = vpop.permute.xlu2 %1334 }
 0x351   : > { %2906 = vmatpush.xpose.msk.msra.mxu1 %vm1027_vm1, %v1341_v29 }
 0x354   : > { %2899 = vmatmul.msk.f32.gmra.mxu1 %vm1027_vm1, %v1151_v27 }
 0x355   : > { %2907 = vmatpush.xpose.msk.msra.mxu1 %vm1027_vm1, %v1339_v30 }
 0x358   : > { %v1498_v31 = vpop.permute.xlu1 %1497  ;;  %v1337_v34 = vpop.permute.xlu2 %1336 }
 0x359   : > { %2914 = vmatpush.xpose.msk.msrb.mxu0 %vm1027_vm1, %v1498_v31 }
 0x35c   : > { %2908 = vmatmul.msk.f32.vlgmr.msra.gmra.mxu1 %vm1027_vm1, %v1335_v32 }
 0x35d   : > { %2915 = vmatpush.xpose.msk.msrb.mxu0 %vm1027_vm1, %v1496_v33 }
 0x360   : > { %v1492_v43 = vpop.permute.xlu1 %1491 }
 0x364   : > { %2909 = vmatmul.msk.f32.gmra.mxu1 %vm1027_vm1, %v1337_v34 }
 0x3c3   : > { %v1142_v35 = vpop.f32.mrf.mxu0 }
 0x3c4   : > { %2904 = vmatmul.msk.f32.vlgmr.msra.gmra.mxu0 %vm1027_vm1, %v1142_v35 }
 0x3c9   : > { %v1181_v36 = vpop.f32.mrf.mxu1 }
 0x3ca   : > { %v1187_v37 = vmul.f32 0.35355338, %v1181_v36 }
 0x3cb   : > { %v1145_v38 = vpop.f32.mrf.mxu0 }
 0x3cc   : > { %2905 = vmatmul.msk.f32.gmra.mxu0 %vm1027_vm1, %v1145_v38  ;;  %v1189_v39 = vadd.f32 %v4056_v28, %v1187_v37 }
 0x3ce   : > { %v1191_v40 = vsel %vm1070_vm2, %v1189_v39, -inf }
 0x3cf   : > { %1192 = vmax.xlane.f32.xlu2 %v1191_v40 }
 0x3d1   : > { %v1184_v41 = vpop.f32.mrf.mxu1 }
 0x3d2   : > { %v1188_v42 = vmul.f32 0.35355338, %v1184_v41 }
 0x3d4   : > { %2916 = vmatmul.msk.f32.vlgmr.msrb.gmra.mxu0 %vm1027_vm1, %v1492_v43  ;;  %v1190_v44 = vadd.f32 %v4056_v28, %v1188_v42 }
 0x3d6   : > { %v1194_v45 = vsel %vm1070_vm2, %v1190_v44, -inf }
 0x3d7   : > { %1195 = vmax.xlane.f32.xlu1 %v1194_v45 }
 0x3d9   : > { %v1367_v46 = vpop.f32.mrf.mxu1 }
 0x3da   : > { %v1373_v47 = vmul.f32 0.35355338, %v1367_v46 }
 0x3dc   : > { %2917 = vmatmul.msk.f32.gmra.mxu0 %vm1027_vm1, %v1494_v48  ;;  %v1375_v49 = vadd.f32 %v4056_v28, %v1373_v47 }
 0x3de   : > { %v1377_v50 = vsel %vm1070_vm2, %v1375_v49, -inf }
 0x3df   : > { %1378 = vmax.xlane.f32.xlu0 %v1377_v50 }
 0x3e1   : > { %v1370_v51 = vpop.f32.mrf.mxu1 }
 0x3e2   : > { %v1374_v52 = vmul.f32 0.35355338, %v1370_v51 }
 0x3e4   : > { %v1376_v53 = vadd.f32 %v4056_v28, %v1374_v52 }
 0x3e6   : > { %v1380_v54 = vsel %vm1070_vm2, %v1376_v53, -inf }
 0x3e7   : > { %1381 = vmax.xlane.f32.xlu2 %v1380_v54 }
 0x441   : > { %v4108_v55 = vpop.f32.mrf.mxu0 }
 0x442   : > { %v1193_v56 = vpop.xlane.xlu2 %1192 }
 0x443   : > { %v1197_v57 = vsub.f32 %v1189_v39, %v1193_v56 }
 0x445   : > { %v1199_v58 = vmul.f32 1.442695, %v1197_v57 }
 0x447   : > { %3175 = vpow2.f32 %v1199_v58 }
 0x449   : > { %v4110_v59 = vpop.f32.mrf.mxu0 }
 0x44a   : > { %v1196_v60 = vpop.xlane.xlu1 %1195 }
 0x44b   : > { %v1198_v62 = vsub.f32 %v1190_v44, %v1196_v60 }
 0x44d   : > { %v4112_v61 = vpop.eup %3175  ;;  %v1201_v0 = vmul.f32 1.442695, %v1198_v62 }
 0x44e   : > { %v1203_v63 = vsel %vm1070_vm2, %v4112_v61, 0.0 }
 0x44f   : > { %1204 = vadd.xlane.f32.xlu2 %v1203_v63  ;;  %3177 = vpow2.f32 %v1201_v0 }
 0x451   : > { %v1524_v1 = vpop.f32.mrf.mxu0 }
 0x452   : > { %v1530_v2 = vmul.f32 0.35355338, %v1524_v1  ;;  %v1379_v3 = vpop.xlane.xlu0 %1378  ;;  %v904_v1 = vld [vmem:[#allocation10 + $0x8] sm:$0xff] }
 0x453   : > { %v1383_v5 = vsub.f32 %v1375_v49, %v1379_v3  ;;  %1297 = vmatpush.msrb.mxu3 %v904_v1 }
 0x454   : > { %v1532_v4 = vadd.f32 %v4056_v28, %v1530_v2 }
 0x455   : > { %v1385_v12 = vmul.f32 1.442695, %v1383_v5  ;;  %v4118_v16 = vpop.eup %3177 }
 0x456   : > { %v1534_v8 = vsel %vm1070_vm2, %v1532_v4, -inf  ;;  %v1206_v20 = vsel %vm1070_vm2, %v4118_v16, 0.0 }
 0x457   : > { %1535 = vmax.xlane.f32.xlu1 %v1534_v8  ;;  %3179 = vpow2.f32 %v1385_v12 }
 0x459   : > { %v1527_v11 = vpop.f32.mrf.mxu0 }
 0x45a   : > { %v1531_v13 = vmul.f32 0.35355338, %v1527_v11  ;;  %v1382_v14 = vpop.xlane.xlu2 %1381 }
 0x45b   : > { %v1384_v17 = vsub.f32 %v1376_v53, %v1382_v14 }
 0x45c   : > { %v1533_v18 = vadd.f32 %v4056_v28, %v1531_v13 }
 0x45d   : > { %v1387_v19 = vmul.f32 1.442695, %v1384_v17  ;;  %v4124_v22 = vpop.eup %3179 }
 0x45e   : > { %v1537_v21 = vsel %vm1070_vm2, %v1533_v18, -inf  ;;  %v1389_v28 = vsel %vm1070_vm2, %v4124_v22, 0.0 }
 0x45f   : > { %3181 = vpow2.f32 %v1387_v19  ;;  %1207 = vadd.xlane.f32.xlu1 %v1206_v20  ;;  %1538 = vmax.xlane.f32.xlu0 %v1537_v21 }
 0x465   : > { %v4126_v23 = vpop.eup %3181 }
 0x466   : > { %v1392_v24 = vsel %vm1070_vm2, %v4126_v23, 0.0 }
 0x467   : > { %3119 = vrot.lane.b32.xlu2 %v4083_v15, %s3647_s23  ;;  %1393 = vadd.xlane.f32.xlu1 %v1392_v24 }
 0x468   : > { %1390 = vadd.xlane.f32.xlu0 %v1389_v28 }
 0x4c2   : > { %v1205_v25 = vpop.xlane.xlu2 %1204 }
 0x4c3   : > { %3183 = vrcp.f32 %v1205_v25  ;;  %v1220_v37 = vand.u32 2147483648, %v1205_v25  ;;  %v1218_v38 = vand.u32 2147483647, %v1205_v25  ;;  %vm1214_vm12 = vweird.f32 %v1205_v25 }
 0x4c5   : > { %v1221_v40 = vor.u32 1.1754944e-38, %v1220_v37  ;;  %vm1219_vm14 = vcmp.eq.f32.partialorder %v1218_v38, 8.507059e+37 }
 0x4c9   : > { %v3184_v26 = vpop.eup %3183 }
 0x4ca   : > { %v1210_v27 = vmul.f32 %v3184_v26, %v1205_v25  ;;  %v3120_v29 = vpop.permute.xlu2 %3119  ;;  %v1536_v30 = vpop.xlane.xlu1 %1535  ;;  %vm1215_vm11 = vweird.f32 %v3184_v26 }
 0x4cb   : > { %v1540_v31 = vsub.f32 %v1532_v4, %v1536_v30  ;;  %v3121_v32 = vunpack.i.l.bf16 %v3120_v29  ;;  %v3122_v35 = vunpack.i.h.bf16 %v3120_v29  ;;  %vm1216_vm13 = vmor %vm1214_vm12, %vm1215_vm11 }
 0x4cc   : > { %v1211_v33 = vsub.f32 1.0, %v1210_v27 }
 0x4cd   : > { %v1542_v34 = vmul.f32 1.442695, %v1540_v31  ;;  %1267 = vmatpush.msrb.mxu2 %v3121_v32 }
 0x4ce   : > { %v1212_v36 = vmul.f32 %v3184_v26, %v1211_v33 }
 0x4cf   : > { %3185 = vpow2.f32 %v1542_v34  ;;  %1268 = vmatpush.msrb.mxu2 %v3122_v35 }
 0x4d0   : > { %v1213_v39 = vadd.f32 %v3184_v26, %v1212_v36 }
 0x4d2   : > { %v1208_v41 = vpop.xlane.xlu1 %1207  ;;  %v1539_v42 = vpop.xlane.xlu0 %1538  ;;  %v1217_v43 = vsel %vm1216_vm13, %v3184_v26, %v1213_v39 }
 0x4d3   : > { %3187 = vrcp.f32 %v1208_v41  ;;  %v1541_v44 = vsub.f32 %v1533_v18, %v1539_v42  ;;  %v1222_v45 = vsel %vm1219_vm14, %v1221_v40, %v1217_v43  ;;  %v1235_v54 = vand.u32 2147483648, %v1208_v41 }
 0x4d4   : > { %v1223_v48 = vmul.f32 %v4112_v61, %v1222_v45  ;;  %v1233_v58 = vand.u32 2147483647, %v1208_v41  ;;  %vm1229_vm3 = vweird.f32 %v1208_v41 }
 0x4d5   : > { %v4134_v46 = vpop.eup %3185  ;;  %v1544_v47 = vmul.f32 1.442695, %v1541_v44  ;;  %v1236_v61 = vor.u32 1.1754944e-38, %v1235_v54 }
 0x4d6   : > { %v1546_v49 = vsel %vm1070_vm2, %v4134_v46, 0.0  ;;  %2900 = vmatmul.msk.f32.vlgmr.msrb.gmra.mxu2 %vm1070_vm2, %v1223_v48  ;;  %vm1234_vm5 = vcmp.eq.f32.partialorder %v1233_v58, 8.507059e+37 }
 0x4d7   : > { %3189 = vpow2.f32 %v1544_v47  ;;  %1547 = vadd.xlane.f32.xlu0 %v1546_v49 }
 0x4d9   : > { %v3188_v50 = vpop.eup %3187 }
 0x4da   : > { %v1225_v51 = vmul.f32 %v3188_v50, %v1208_v41  ;;  %vm1230_vm15 = vweird.f32 %v3188_v50  ;;  %v1394_v3 = vpop.xlane.xlu1 %1393 }
 0x4db   : > { %vm1231_vm4 = vmor %vm1229_vm3, %vm1230_vm15  ;;  %v1391_v2 = vpop.xlane.xlu0 %1390  ;;  %v1421_v34 = vand.u32 2147483648, %v1394_v3  ;;  %vm1415_vm11 = vweird.f32 %v1394_v3  ;;  %v1419_v39 = vand.u32 2147483647, %v1394_v3 }
 0x4dc   : > { %v1226_v52 = vsub.f32 1.0, %v1225_v51  ;;  %3191 = vrcp.f32 %v1391_v2  ;;  %vm1400_vm7 = vweird.f32 %v1391_v2  ;;  %v1404_v21 = vand.u32 2147483647, %v1391_v2 }
 0x4dd   : > { %v4140_v53 = vpop.eup %3189  ;;  %3193 = vrcp.f32 %v1394_v3  ;;  %v1422_v41 = vor.u32 1.1754944e-38, %v1421_v34  ;;  %vm1420_vm14 = vcmp.eq.f32.partialorder %v1419_v39, 8.507059e+37 }
 0x4de   : > { %v1227_v56 = vmul.f32 %v3188_v50, %v1226_v52  ;;  %v1549_v57 = vsel %vm1070_vm2, %v4140_v53, 0.0  ;;  %vm1405_vm9 = vcmp.eq.f32.partialorder %v1404_v21, 8.507059e+37 }
 0x4df   : > { %1550 = vadd.xlane.f32.xlu1 %v1549_v57 }
 0x4e0   : > { %v1228_v60 = vadd.f32 %v3188_v50, %v1227_v56 }
 0x4e2   : > { %v1232_v62 = vsel %vm1231_vm4, %v3188_v50, %v1228_v60  ;;  %v3192_v4 = vpop.eup %3191 }
 0x4e3   : > { %v1237_v63 = vsel %vm1234_vm5, %v1236_v61, %v1232_v62  ;;  %v1396_v5 = vmul.f32 %v3192_v4, %v1391_v2  ;;  %v3194_v12 = vpop.eup %3193  ;;  %vm1401_vm6 = vweird.f32 %v3192_v4 }
 0x4e4   : > { %v1238_v0 = vmul.f32 %v4118_v16, %v1237_v63  ;;  %v1411_v13 = vmul.f32 %v3194_v12, %v1394_v3  ;;  %vm1402_vm8 = vmor %vm1400_vm7, %vm1401_vm6  ;;  %vm1416_vm10 = vweird.f32 %v3194_v12  ;;  %v906_v3 = vld [vmem:[#allocation10 + $0x18] sm:$0xff] }
 0x4e5   : > { %v1397_v11 = vsub.f32 1.0, %v1396_v5  ;;  %vm1417_vm12 = vmor %vm1415_vm11, %vm1416_vm10 }
 0x4e6   : > { %2901 = vmatmul.msk.f32.gmra.mxu2 %vm1070_vm2, %v1238_v0  ;;  %v1412_v18 = vsub.f32 1.0, %v1411_v13 }
 0x4e7   : > { %v1398_v14 = vmul.f32 %v3192_v4, %v1397_v11 }
 0x4e8   : > { %v1413_v28 = vmul.f32 %v3194_v12, %v1412_v18 }
 0x4e9   : > { %v1399_v19 = vadd.f32 %v3192_v4, %v1398_v14 }
 0x4ea   : > { %v1414_v33 = vadd.f32 %v3194_v12, %v1413_v28 }
 0x4eb   : > { %3124 = vrot.lane.b32.xlu0 %v4083_v15, %s3648_s21  ;;  %v1403_v25 = vsel %vm1402_vm8, %v3192_v4, %v1399_v19 }
 0x4ec   : > { %v1418_v40 = vsel %vm1417_vm12, %v3194_v12, %v1414_v33  ;;  %v1717_v33 = vld [vmem:[#allocation13] sm:$0xff] }
 0x4ed   : > { %v1423_v47 = vsel %vm1420_vm14, %v1422_v41, %v1418_v40 }
 0x4ee   : > { %v1424_v51 = vmul.f32 %v4126_v23, %v1423_v47 }
 0x4f8   : > { %3129 = vrot.lane.b32.xlu1 %v4083_v15, %s3649_s28  ;;  %v1406_v15 = vand.u32 2147483648, %v1391_v2  ;;  %v905_v2 = vld [vmem:[#allocation10 + $0x10] sm:$0xff] }
 0x4f9   : > { %1481 = vmatpush.msra.mxu3 %v905_v2 }
 0x4fa   : > { %v1407_v26 = vor.u32 1.1754944e-38, %v1406_v15 }
 0x4fc   : > { %v1408_v31 = vsel %vm1405_vm9, %v1407_v26, %v1403_v25 }
 0x4fd   : > { %v1409_v38 = vmul.f32 %v4124_v22, %v1408_v31 }
 0x54a   : > { %v1548_v8 = vpop.xlane.xlu0 %1547 }
 0x54b   : > { %3195 = vrcp.f32 %v1548_v8  ;;  %v1563_v44 = vand.u32 2147483648, %v1548_v8  ;;  %vm1557_vm15 = vweird.f32 %v1548_v8  ;;  %v1561_v45 = vand.u32 2147483647, %v1548_v8 }
 0x54d   : > { %v1564_v50 = vor.u32 1.1754944e-38, %v1563_v44  ;;  %vm1562_vm4 = vcmp.eq.f32.partialorder %v1561_v45, 8.507059e+37 }
 0x551   : > { %v3196_v17 = vpop.eup %3195 }
 0x552   : > { %v4150_v16 = vpop.xlane.xlu1 %1550  ;;  %v1553_v20 = vmul.f32 %v3196_v17, %v1548_v8  ;;  %vm1558_vm13 = vweird.f32 %v3196_v17 }
 0x553   : > { %3197 = vrcp.f32 %v4150_v16  ;;  %vm1559_vm3 = vmor %vm1557_vm15, %vm1558_vm13  ;;  %v1578_v58 = vand.u32 2147483648, %v4150_v16  ;;  %vm1572_vm6 = vweird.f32 %v4150_v16  ;;  %v1576_v23 = vand.u32 2147483647, %v4150_v16 }
 0x554   : > { %v1554_v27 = vsub.f32 1.0, %v1553_v20 }
 0x555   : > { %v1579_v63 = vor.u32 1.1754944e-38, %v1578_v58  ;;  %vm1577_vm8 = vcmp.eq.f32.partialorder %v1576_v23, 8.507059e+37 }
 0x556   : > { %v1555_v35 = vmul.f32 %v3196_v17, %v1554_v27 }
 0x558   : > { %v1556_v42 = vadd.f32 %v3196_v17, %v1555_v35 }
 0x559   : > { %v1270_v24 = vpop.f32.mrf.mxu2  ;;  %v3198_v29 = vpop.eup %3197 }
 0x55a   : > { %2902 = vmatmul.msk.f32.vlgmr.msrb.gmra.mxu3 %vm1027_vm1, %v1270_v24  ;;  %v1568_v36 = vmul.f32 %v3198_v29, %v4150_v16  ;;  %v1560_v48 = vsel %vm1559_vm3, %v3196_v17, %v1556_v42  ;;  %vm1573_vm5 = vweird.f32 %v3198_v29  ;;  %v3155_v16 = vld [vmem:[#allocation11] ss:$0 sm:$0xff] }
 0x55b   : > { %v1565_v54 = vsel %vm1562_vm4, %v1564_v50, %v1560_v48  ;;  %vm1574_vm7 = vmor %vm1572_vm6, %vm1573_vm5 }
 0x55c   : > { %v1569_v43 = vsub.f32 1.0, %v1568_v36  ;;  %v1566_v61 = vmul.f32 %v4134_v46, %v1565_v54  ;;  %v1719_v36 = vld [vmem:[#allocation13 + $0x10] sm:$0xff]  ;;  %v4189_v54 = vld [vmem:[#allocation14] ss:$0 sm:$0xff] }
 0x55d   : > { %v3125_v30 = vpop.permute.xlu0 %3124 }
 0x55e   : > { %v3126_v32 = vunpack.i.l.bf16 %v3125_v30  ;;  %v3127_v37 = vunpack.i.h.bf16 %v3125_v30  ;;  %v1570_v49 = vmul.f32 %v3198_v29, %v1569_v43  ;;  %v3650_v30 = vmov 32.0  }
 0x55f   : > { %3199 = vrcp.f32 %v3650_v30 }
 0x560   : > { %1451 = vmatpush.msra.mxu2 %v3126_v32  ;;  %v1571_v57 = vadd.f32 %v3198_v29, %v1570_v49 }
 0x562   : > { %1452 = vmatpush.msra.mxu2 %v3127_v37  ;;  %v1575_v62 = vsel %vm1574_vm7, %v3198_v29, %v1571_v57 }
 0x563   : > { %2910 = vmatmul.msk.f32.vlgmr.msra.gmra.mxu2 %vm1070_vm2, %v1409_v38  ;;  %v1580_v0 = vsel %vm1577_vm8, %v1579_v63, %v1575_v62 }
 0x564   : > { %v1581_v1 = vmul.f32 %v4140_v53, %v1580_v0  ;;  %1638 = vmatpush.msrb.mxu2 %v906_v3 }
 0x565   : > { %v3200_v31 = vpop.eup %3199 }
 0x566   : > { %v1664_v32 = vmul.f32 32.0, %v3200_v31 }
 0x568   : > { %v1665_v35 = vsub.f32 1.0, %v1664_v32 }
 0x569   : > { %v1273_v22 = vpop.f32.mrf.mxu2 }
 0x56a   : > { %2903 = vmatmul.msk.f32.gmra.mxu3 %vm1027_vm1, %v1273_v22  ;;  %v3130_v52 = vpop.permute.xlu1 %3129 }
 0x56b   : > { %v3131_v56 = vunpack.i.l.bf16 %v3130_v52  ;;  %2911 = vmatmul.msk.f32.gmra.mxu2 %vm1070_vm2, %v1424_v51  ;;  %v3132_v60 = vunpack.i.h.bf16 %v3130_v52 }
 0x56d   : > { %1608 = vmatpush.msrb.mxu1 %v3131_v56 }
 0x56f   : > { %1609 = vmatpush.msrb.mxu1 %v3132_v60 }
 0x570   : > { %2918 = vmatmul.msk.f32.vlgmr.msrb.gmra.mxu1 %vm1070_vm2, %v1566_v61 }
 0x578   : > { %2919 = vmatmul.msk.f32.gmra.mxu1 %vm1070_vm2, %v1581_v1  ;;  %vm1668_vm2 = vweird.f32 %v3200_v31 }
 0x5dd   : > { %v1299_v11 = vpop.f32.mrf.mxu3 }
 0x5de   : > { %v1329_v13 = vadd.f32 %v4108_v55, %v1299_v11 }
 0x5e6   : > { %v1454_v4 = vpop.f32.mrf.mxu2 }
 0x5e7   : > { %2912 = vmatmul.msk.f32.vlgmr.msra.gmra.mxu3 %vm1027_vm1, %v1454_v4 }
 0x5ed   : > { %v1611_v46 = vpop.f32.mrf.mxu1  ;;  %v1302_v53 = vpop.f32.mrf.mxu3 }
 0x5ee   : > { %v1457_v5 = vpop.f32.mrf.mxu2  ;;  %2920 = vmatmul.msk.f32.vlgmr.msrb.gmra.mxu2 %vm1027_vm1, %v1611_v46  ;;  %v1332_v20 = vadd.f32 %v4110_v59, %v1302_v53  ;;  %v1718_v59 = vld [vmem:[#allocation13 + $0x8] sm:$0xff] }
 0x5ef   : > { %2913 = vmatmul.msk.f32.gmra.mxu3 %vm1027_vm1, %v1457_v5  ;;  %v4177_v34 = vpack.i.bf16 %v1717_v33, %v1718_v59  ;;  %v4195_v5 = vld [vmem:[%s3966_s11] sm:$0xff]  ;;  %s4537_s11 = sld [smem:[#allocation48_spill]] }
 0x5f5   : > { %v1614_v8 = vpop.f32.mrf.mxu1 }
 0x5f6   : > { %2921 = vmatmul.msk.f32.gmra.mxu2 %vm1027_vm1, %v1614_v8  ;;  %v893_v8 = vld [vmem:[%s3973_s12] sm:$0xff]  ;;  %s2641_s12 = scalar_lea.hbm %s4537_s11, %s2965_s8 }
 0x5f7   : > { %s2644_s30 = sshll.u32 %s2641_s12, 4  ;;  %s2645_s30 = int_to_ptr.hbm [resolvable:$true] %s2644_s30 }
 0x66a   : > { %v1483_v12 = vpop.f32.mrf.mxu3 }
 0x66b   : > { %v1489_v14 = vadd.f32 %v1483_v12, %v1329_v13  ;;  %v3156_v12 = vld [vmem:[%s4459_s18] ss:$0 sm:$0xff] }
 0x671   : > { %v1640_v17 = vpop.f32.mrf.mxu2 }
 0x672   : > { %v1646_v18 = vadd.f32 %v1640_v17, %v1489_v14  ;;  %v1486_v15 = vpop.f32.mrf.mxu3  ;;  %v1716_v17 = vadd.f32 %v893_v8, %v4195_v5 }
 0x673   : > { %v1490_v24 = vadd.f32 %v1486_v15, %v1332_v20 }
 0x674   : > { %v1651_v19 = vadd.f32 %v3155_v16, %v1646_v18  ;;  %v3157_v18 = vld [vmem:[%s4460_s19] ss:$0 sm:$0xff] }
 0x676   : > { %v1653_v21 = vadd.f32 %v1651_v19, %v4023_v6  ;;  %v1720_v6 = vld [vmem:[#allocation13 + $0x18] sm:$0xff] }
 0x677   : > { %1748 = vmatpush.msrb.mxu3 %v1720_v6  ;;  %v3133_v50 = vpack.i.bf16 %v1719_v36, %v1720_v6 }
 0x678   : > { %v1657_v28 = vsel %vm911_vm0, %v1653_v21, 0.0 }
 0x679   : > { %1658 = vadd.xlane.f32.xlu2 %v1657_v28  ;;  %v1643_v25 = vpop.f32.mrf.mxu2  ;;  %1749 = vmatpush.msrb.mxu3 %v1719_v36 }
 0x67a   : > { %v1647_v26 = vadd.f32 %v1643_v25, %v1490_v24 }
 0x67b   : > { %1750 = vmatpush.msrb.mxu3 %v1718_v59 }
 0x67c   : > { %v1652_v27 = vadd.f32 %v3155_v16, %v1647_v26 }
 0x67d   : > { %1751 = vmatpush.msrb.mxu3 %v1717_v33 }
 0x67e   : > { %v1654_v29 = vadd.f32 %v1652_v27, %v4030_v9  ;;  %v1666_v9 = vmul.f32 %v3200_v31, %v1665_v35  ;;  %v4226_v35 = vld [vmem:[%s767_s25] ss:$0 sm:$0xff] }
 0x680   : > { %v1660_v55 = vsel %vm911_vm0, %v1654_v29, 0.0  ;;  %v1667_v37 = vadd.f32 %v3200_v31, %v1666_v9 }
 0x681   : > { %1661 = vadd.xlane.f32.xlu0 %v1660_v55 }
 0x682   : > { %v4181_v38 = vsel %vm1668_vm2, %v3200_v31, %v1667_v37 }
 0x695   : > { %3139 = vrot.lane.b32.xlu0 %v4177_v34, %s3645_s14 }
 0x69d   : > { %3144 = vrot.lane.b32.xlu0 %v3133_v50, %s3646_s1 }
 0x6ec   : > { %v1659_v39 = vpop.xlane.xlu2 %1658 }
 0x6ed   : > { %v1670_v40 = vmul.f32 %v4181_v38, %v1659_v39 }
 0x6ef   : > { %v1672_v41 = vsub.f32 %v1653_v21, %v1670_v40 }
 0x6f1   : > { %v1674_v42 = vmul.f32 %v1672_v41, %v1672_v41 }
 0x6f3   : > { %v1676_v43 = vsel %vm911_vm0, %v1674_v42, 0.0 }
 0x6f4   : > { %1677 = vadd.xlane.f32.xlu1 %v1676_v43  ;;  %v1662_v44 = vpop.xlane.xlu0 %1661 }
 0x6f5   : > { %v1671_v45 = vmul.f32 %v4181_v38, %v1662_v44 }
 0x6f7   : > { %v1673_v47 = vsub.f32 %v1654_v29, %v1671_v45 }
 0x6f9   : > { %v1675_v48 = vmul.f32 %v1673_v47, %v1673_v47 }
 0x6fb   : > { %v1679_v49 = vsel %vm911_vm0, %v1675_v48, 0.0 }
 0x6fc   : > { %1680 = vadd.xlane.f32.xlu2 %v1679_v49 }
 0x707   : > { %v3140_v0 = vpop.permute.xlu0 %3139 }
 0x708   : > { %v3141_v46 = vunpack.i.l.bf16 %v3140_v0  ;;  %v3142_v13 = vunpack.i.h.bf16 %v3140_v0 }
 0x70d   : > { %1775 = vrot.lane.b32.xlu1 %v4189_v54, %s3645_s14 }
 0x70f   : > { %v3145_v43 = vpop.permute.xlu0 %3144 }
 0x710   : > { %v3147_v45 = vunpack.i.h.bf16 %v3145_v43 }
 0x714   : > { %3134 = vrot.lane.b32.xlu2 %v3133_v50, %s3645_s14  ;;  %s2879_s14 = sshll.u32 %s3962_s29, 4 }
 0x715   : > { %s877_s25 = scalar_lea.vmem [#allocation19], %s2879_s14 }
 0x716   : > { %s2642_s0 = sshll.u32 %s877_s25, 4  ;;  %s2643_s0 = int_to_ptr.vmem [resolvable:$true] %s2642_s0 }
 0x71c   : > { %3149 = vrot.lane.b32.xlu2 %v4177_v34, %s3646_s1 }
 0x767   : > { %v1678_v22 = vpop.xlane.xlu1 %1677 }
 0x768   : > { %v1682_v51 = vmul.f32 %v1678_v22, %v4181_v38 }
 0x76a   : > { %v1684_v52 = vadd.f32 1e-05, %v1682_v51 }
 0x76c   : > { %3201 = vrsqrt.f32 %v1684_v52  ;;  %vm1692_vm10 = vweird.f32 %v1684_v52 }
 0x76f   : > { %v1681_v56 = vpop.xlane.xlu2 %1680 }
 0x770   : > { %v1683_v57 = vmul.f32 %v1681_v56, %v4181_v38 }
 0x772   : > { %v3202_v58 = vpop.eup %3201  ;;  %v1685_v60 = vadd.f32 1e-05, %v1683_v57 }
 0x773   : > { %v1687_v61 = vmul.f32 %v3202_v58, %v1684_v52  ;;  %vm1693_vm9 = vweird.f32 %v3202_v58 }
 0x774   : > { %3203 = vrsqrt.f32 %v1685_v60  ;;  %vm1694_vm11 = vmor %vm1692_vm10, %vm1693_vm9  ;;  %vm1702_vm13 = vweird.f32 %v1685_v60 }
 0x775   : > { %v1688_v23 = vmul.f32 %v3202_v58, %v1687_v61 }
 0x777   : > { %v1689_v62 = vmul.f32 0.5, %v1688_v23  ;;  %v3135_v63 = vpop.permute.xlu2 %3134 }
 0x778   : > { %v3137_v1 = vunpack.i.h.bf16 %v3135_v63  ;;  %v3136_v2 = vunpack.i.l.bf16 %v3135_v63 }
 0x779   : > { %v1690_v3 = vsub.f32 1.5, %v1689_v62 }
 0x77a   : > { %v3204_v4 = vpop.eup %3203  ;;  %1793 = vmatpush.msra.mxu0 %v3136_v2 }
 0x77b   : > { %v1691_v11 = vmul.f32 %v3202_v58, %v1690_v3  ;;  %v1697_v53 = vmul.f32 %v3204_v4, %v1685_v60  ;;  %vm1703_vm12 = vweird.f32 %v3204_v4 }
 0x77c   : > { %1794 = vmatpush.msra.mxu0 %v3137_v1  ;;  %vm1704_vm14 = vmor %vm1702_vm13, %vm1703_vm12  ;;  %v1722_v1 = vld [vmem:[#allocation16] sm:$0xff] }
 0x77d   : > { %v1695_v14 = vsel %vm1694_vm11, %v3202_v58, %v1691_v11  ;;  %v1698_v16 = vmul.f32 %v3204_v4, %v1697_v53 }
 0x77e   : > { %v1706_v19 = vmul.f32 %v1695_v14, %v1672_v41  ;;  %1795 = vmatpush.msra.mxu0 %v3141_v46 }
 0x77f   : > { %v1699_v15 = vmul.f32 0.5, %v1698_v16  ;;  %v1776_v31 = vpop.permute.xlu1 %1775  ;;  %v3150_v44 = vpop.permute.xlu2 %3149 }
 0x780   : > { %v1709_v20 = vmul.f32 %v3156_v12, %v1706_v19  ;;  %1796 = vmatpush.msra.mxu0 %v3142_v13  ;;  %v3151_v48 = vunpack.i.l.bf16 %v3150_v44  ;;  %v3152_v49 = vunpack.i.h.bf16 %v3150_v44 }
 0x781   : > { %v1700_v21 = vsub.f32 1.5, %v1699_v15  ;;  %2924 = vmatmul.msk.f32.vlgmr.msra.gmra.mxu0 %vm911_vm0, %v1716_v17 }
 0x782   : > { %v4206_v24 = vadd.f32 %v3157_v18, %v1709_v20 }
 0x783   : > { %v1701_v28 = vmul.f32 %v3204_v4, %v1700_v21 }
 0x784   : > { %v1714_v25 = vadd.f32 %v4206_v24, %v4025_v7 }
 0x785   : > { %v1705_v26 = vsel %vm1704_vm14, %v3204_v4, %v1701_v28 }
 0x786   : > { %v1707_v27 = vmul.f32 %v1705_v26, %v1673_v47  ;;  %2922 = vmatmul.msk.f32.vlgmr.msrb.gmra.mxu3 %vm911_vm0, %v1714_v25  ;;  %v3146_v47 = vunpack.i.l.bf16 %v3145_v43 }
 0x788   : > { %v1710_v29 = vmul.f32 %v3156_v12, %v1707_v27  ;;  %1831 = vmatpush.msra.mxu1 %v3146_v47 }
 0x78a   : > { %v4211_v55 = vadd.f32 %v3157_v18, %v1710_v29  ;;  %1832 = vmatpush.msra.mxu1 %v3147_v45 }
 0x78c   : > { %v1715_v30 = vadd.f32 %v4211_v55, %v4032_v10  ;;  %1833 = vmatpush.msra.mxu1 %v3151_v48 }
 0x78e   : > { %2923 = vmatmul.msk.f32.gmra.mxu3 %vm911_vm0, %v1715_v30  ;;  %1834 = vmatpush.msra.mxu1 %v3152_v49 }
 0x78f   : > { %2925 = vmatmul.msk.f32.vlgmr.msra.gmra.mxu1 %vm911_vm0, %v4195_v5 }
 0x7fe   : > { %v1798_v7 = vpop.f32.mrf.mxu0 }
 0x7ff   : > { %v1799_v32 = vadd.f32 %v1798_v7, %v1776_v31 }
 0x801   : > { %2926 = vmatpush.xpose.msk.msra.mxu2 %vm1027_vm1, %v1799_v32 }
 0x809   : > { %v1753_v33 = vpop.f32.mrf.mxu3 }
 0x80a   : > { %v1754_v59 = vadd.f32 %v4189_v54, %v1753_v33 }
 0x80c   : > { %2927 = vmatmul.msk.f32.vlgmr.msra.gmra.mxu2 %vm1027_vm1, %v1754_v59  ;;  %v1836_v62 = vpop.f32.mrf.mxu1 }
 0x811   : > { %v1756_v6 = vpop.f32.mrf.mxu3 }
 0x812   : > { %v1757_v10 = vadd.f32 %v4189_v54, %v1756_v6 }
 0x814   : > { %2928 = vmatmul.msk.f32.gmra.mxu2 %vm1027_vm1, %v1757_v10 }
 0x88f   : > { %v1865_v36 = vpop.f32.mrf.mxu2 }
 0x890   : > { %v1871_v34 = vmul.f32 0.35355338, %v1865_v36 }
 0x892   : > { %v1876_v9 = vadd.f32 %v4226_v35, %v1871_v34 }
 0x894   : > { %v1878_v37 = vsel %vm1027_vm1, %v1876_v9, -inf }
 0x895   : > { %1879 = vmax.xlane.f32.xlu0 %v1878_v37 }
 0x897   : > { %v1868_v39 = vpop.f32.mrf.mxu2 }
 0x898   : > { %v1872_v40 = vmul.f32 0.35355338, %v1868_v39 }
 0x89a   : > { %v1877_v41 = vadd.f32 %v4226_v35, %v1872_v40 }
 0x89c   : > { %v1881_v42 = vsel %vm1027_vm1, %v1877_v41, -inf }
 0x89d   : > { %1882 = vmax.xlane.f32.xlu2 %v1881_v42 }
 0x8b5   : > { %1813 = vrot.lane.b32.xlu2 %v4189_v54, %s3646_s1  ;;  %s3565_s1 = scalar_lea.hbm %s4537_s11, 32 }
 0x8bd   : > { %1957 = vrot.lane.b32.xlu2 %v1757_v10, %s3647_s23 }
 0x8c5   : > { %2133 = vrot.lane.b32.xlu2 %v1754_v59, %s3648_s21 }
 0x8cd   : > { %2285 = vrot.lane.b32.xlu2 %v1757_v10, %s3649_s28 }
 0x908   : > { %v1880_v50 = vpop.xlane.xlu0 %1879 }
 0x909   : > { %v1884_v22 = vsub.f32 %v1876_v9, %v1880_v50 }
 0x90b   : > { %v1886_v51 = vmul.f32 1.442695, %v1884_v22 }
 0x90d   : > { %3205 = vpow2.f32 %v1886_v51 }
 0x910   : > { %v1883_v52 = vpop.xlane.xlu2 %1882 }
 0x911   : > { %v1885_v56 = vsub.f32 %v1877_v41, %v1883_v52 }
 0x913   : > { %v3206_v57 = vpop.eup %3205  ;;  %v1888_v58 = vmul.f32 1.442695, %v1885_v56 }
 0x914   : > { %v1890_v60 = vsel %vm1027_vm1, %v3206_v57, 0.0 }
 0x915   : > { %3207 = vpow2.f32 %v1888_v58  ;;  %1891 = vadd.xlane.f32.xlu1 %v1890_v60 }
 0x918   : > { %v1814_v23 = vpop.permute.xlu2 %1813 }
 0x919   : > { %v4247_v63 = vadd.f32 %v1836_v62, %v1814_v23 }
 0x91b   : > { %v3208_v61 = vpop.eup %3207  ;;  %1947 = vmatpush.msra.mxu3 %v4247_v63 }
 0x91c   : > { %v1893_v54 = vsel %vm1027_vm1, %v3208_v61, 0.0 }
 0x91d   : > { %1894 = vadd.xlane.f32.xlu0 %v1893_v54  ;;  %2125 = vmatpush.msrb.mxu3 %v1722_v1 }
 0x92e   : > { %1959 = vrot.lane.b32.xlu1 %v1799_v32, %s3647_s23 }
 0x931   : > { %1955 = vrot.lane.b32.xlu0 %v1754_v59, %s3647_s23 }
 0x936   : > { %2287 = vrot.lane.b32.xlu1 %v1799_v32, %s3649_s28 }
 0x939   : > { %2137 = vrot.lane.b32.xlu0 %v1799_v32, %s3648_s21  ;;  %v1958_v32 = vpop.permute.xlu2 %1957 }
 0x93e   : > { %2135 = vrot.lane.b32.xlu1 %v1757_v10, %s3648_s21 }
 0x941   : > { %2283 = vrot.lane.b32.xlu0 %v1754_v59, %s3649_s28  ;;  %v2134_v59 = vpop.permute.xlu2 %2133 }
 0x949   : > { %v2286_v50 = vpop.permute.xlu2 %2285 }
 0x988   : > { %v1892_v0 = vpop.xlane.xlu1 %1891 }
 0x989   : > { %3209 = vrcp.f32 %v1892_v0  ;;  %v1907_v5 = vand.u32 2147483648, %v1892_v0  ;;  %v1905_v11 = vand.u32 2147483647, %v1892_v0  ;;  %vm1901_vm3 = vweird.f32 %v1892_v0 }
 0x98b   : > { %v1908_v13 = vor.u32 1.1754944e-38, %v1907_v5  ;;  %vm1906_vm5 = vcmp.eq.f32.partialorder %v1905_v11, 8.507059e+37 }
 0x98f   : > { %v3210_v2 = vpop.eup %3209 }
 0x990   : > { %v1897_v3 = vmul.f32 %v3210_v2, %v1892_v0  ;;  %v1895_v4 = vpop.xlane.xlu0 %1894  ;;  %vm1902_vm15 = vweird.f32 %v3210_v2 }
 0x991   : > { %3211 = vrcp.f32 %v1895_v4  ;;  %vm1903_vm4 = vmor %vm1901_vm3, %vm1902_vm15  ;;  %v1922_v15 = vand.u32 2147483648, %v1895_v4  ;;  %v1920_v21 = vand.u32 2147483647, %v1895_v4  ;;  %vm1916_vm7 = vweird.f32 %v1895_v4 }
 0x992   : > { %v1898_v46 = vsub.f32 1.0, %v1897_v3 }
 0x993   : > { %v1923_v25 = vor.u32 1.1754944e-38, %v1922_v15  ;;  %vm1921_vm2 = vcmp.eq.f32.partialorder %v1920_v21, 8.507059e+37 }
 0x994   : > { %v1899_v8 = vmul.f32 %v3210_v2, %v1898_v46 }
 0x996   : > { %v1900_v53 = vadd.f32 %v3210_v2, %v1899_v8 }
 0x997   : > { %v3212_v12 = vpop.eup %3211 }
 0x998   : > { %v1904_v14 = vsel %vm1903_vm4, %v3210_v2, %v1900_v53  ;;  %v1912_v16 = vmul.f32 %v3212_v12, %v1895_v4  ;;  %vm1917_vm6 = vweird.f32 %v3212_v12 }
 0x999   : > { %v1909_v17 = vsel %vm1906_vm5, %v1908_v13, %v1904_v14  ;;  %vm1918_vm8 = vmor %vm1916_vm7, %vm1917_vm6 }
 0x99a   : > { %v1913_v18 = vsub.f32 1.0, %v1912_v16  ;;  %v1910_v19 = vmul.f32 %v3206_v57, %v1909_v17 }
 0x99c   : > { %v1914_v20 = vmul.f32 %v3212_v12, %v1913_v18  ;;  %2929 = vmatmul.msk.f32.vlgmr.msra.gmra.mxu3 %vm1027_vm1, %v1910_v19 }
 0x99e   : > { %v1915_v28 = vadd.f32 %v3212_v12, %v1914_v20 }
 0x9a0   : > { %v1960_v26 = vpop.permute.xlu1 %1959  ;;  %v1919_v27 = vsel %vm1918_vm8, %v3212_v12, %v1915_v28 }
 0x9a1   : > { %2931 = vmatpush.xpose.msk.msrb.mxu0 %vm1027_vm1, %v1960_v26  ;;  %v1924_v29 = vsel %vm1921_vm2, %v1923_v25, %v1919_v27 }
 0x9a2   : > { %v1925_v30 = vmul.f32 %v3208_v61, %v1924_v29 }
 0x9a3   : > { %v1956_v31 = vpop.permute.xlu0 %1955 }
 0x9a4   : > { %2930 = vmatmul.msk.f32.gmra.mxu3 %vm1027_vm1, %v1925_v30  ;;  %2932 = vmatmul.msk.f32.vlgmr.msrb.gmra.mxu0 %vm1027_vm1, %v1956_v31 }
 0x9a8   : > { %v2288_v7 = vpop.permute.xlu1 %2287 }
 0x9a9   : > { %2947 = vmatpush.xpose.msk.msra.mxu3 %vm1027_vm1, %v2288_v7 }
 0x9ab   : > { %v2138_v33 = vpop.permute.xlu0 %2137 }
 0x9ac   : > { %2933 = vmatmul.msk.f32.gmra.mxu0 %vm1027_vm1, %v1958_v32 }
 0x9ad   : > { %2940 = vmatpush.xpose.msk.msra.mxu0 %vm1027_vm1, %v2138_v33 }
 0x9b0   : > { %v2136_v6 = vpop.permute.xlu1 %2135 }
 0x9b3   : > { %v2284_v44 = vpop.permute.xlu0 %2283 }
 0x9b4   : > { %2941 = vmatmul.msk.f32.vlgmr.msra.gmra.mxu0 %vm1027_vm1, %v2134_v59 }
 0x9bc   : > { %2942 = vmatmul.msk.f32.gmra.mxu0 %vm1027_vm1, %v2136_v6 }
 0xa1f   : > { %v1949_v10 = vpop.f32.mrf.mxu3 }
 0xa20   : > { %2938 = vmatmul.msk.f32.vlgmr.msrb.gmra.mxu3 %vm1027_vm1, %v1949_v10 }
 0xa21   : > { %v1984_v36 = vpop.f32.mrf.mxu0 }
 0xa22   : > { %v1990_v34 = vmul.f32 0.35355338, %v1984_v36 }
 0xa24   : > { %v1992_v9 = vadd.f32 %v4226_v35, %v1990_v34 }
 0xa26   : > { %v1994_v37 = vsel %vm1027_vm1, %v1992_v9, -inf }
 0xa27   : > { %1995 = vmax.xlane.f32.xlu0 %v1994_v37  ;;  %v1952_v39 = vpop.f32.mrf.mxu3 }
 0xa28   : > { %2939 = vmatmul.msk.f32.gmra.mxu3 %vm1027_vm1, %v1952_v39 }
 0xa29   : > { %v1987_v40 = vpop.f32.mrf.mxu0 }
 0xa2a   : > { %v1991_v41 = vmul.f32 0.35355338, %v1987_v40 }
 0xa2c   : > { %v1993_v42 = vadd.f32 %v4226_v35, %v1991_v41 }
 0xa2e   : > { %v1997_v43 = vsel %vm1027_vm1, %v1993_v42, -inf }
 0xa2f   : > { %1998 = vmax.xlane.f32.xlu1 %v1997_v43 }
 0xa30   : > { %2948 = vmatmul.msk.f32.vlgmr.msra.gmra.mxu3 %vm1027_vm1, %v2284_v44 }
 0xa31   : > { %v2162_v45 = vpop.f32.mrf.mxu0 }
 0xa32   : > { %v2168_v47 = vmul.f32 0.35355338, %v2162_v45 }
 0xa34   : > { %v2170_v48 = vadd.f32 %v4226_v35, %v2168_v47 }
 0xa36   : > { %v2172_v49 = vsel %vm1027_vm1, %v2170_v48, -inf }
 0xa37   : > { %2173 = vmax.xlane.f32.xlu2 %v2172_v49 }
 0xa38   : > { %2949 = vmatmul.msk.f32.gmra.mxu3 %vm1027_vm1, %v2286_v50 }
 0xa39   : > { %v2165_v22 = vpop.f32.mrf.mxu0 }
 0xa3a   : > { %v2169_v51 = vmul.f32 0.35355338, %v2165_v22 }
 0xa3c   : > { %v2171_v52 = vadd.f32 %v4226_v35, %v2169_v51 }
 0xa3e   : > { %v2175_v56 = vsel %vm1027_vm1, %v2171_v52, -inf }
 0xa3f   : > { %2176 = vmax.xlane.f32.xlu0 %v2175_v56 }
 0xa9a   : > { %v1996_v57 = vpop.xlane.xlu0 %1995 }
 0xa9b   : > { %v2000_v58 = vsub.f32 %v1992_v9, %v1996_v57 }
 0xa9d   : > { %v2002_v60 = vmul.f32 1.442695, %v2000_v58 }
 0xa9f   : > { %3213 = vpow2.f32 %v2002_v60 }
 0xaa2   : > { %v1999_v0 = vpop.xlane.xlu1 %1998 }
 0xaa3   : > { %v4271_v61 = vpop.f32.mrf.mxu3  ;;  %v2001_v1 = vsub.f32 %v1993_v42, %v1999_v0  ;;  %v1723_v0 = vld [vmem:[#allocation16 + $0x8] sm:$0xff] }
 0xaa4   : > { %2096 = vmatpush.msrb.mxu2 %v1723_v0 }
 0xaa5   : > { %v3214_v54 = vpop.eup %3213  ;;  %v2004_v2 = vmul.f32 1.442695, %v2001_v1 }
 0xaa6   : > { %v2006_v23 = vsel %vm1027_vm1, %v3214_v54, 0.0 }
 0xaa7   : > { %2007 = vadd.xlane.f32.xlu0 %v2006_v23  ;;  %3215 = vpow2.f32 %v2004_v2 }
 0xaaa   : > { %v2174_v3 = vpop.xlane.xlu2 %2173 }
 0xaab   : > { %v4274_v62 = vpop.f32.mrf.mxu3  ;;  %v2178_v8 = vsub.f32 %v2170_v48, %v2174_v3 }
 0xaad   : > { %v2180_v13 = vmul.f32 1.442695, %v2178_v8  ;;  %v4280_v18 = vpop.eup %3215 }
 0xaae   : > { %v2009_v15 = vsel %vm1027_vm1, %v4280_v18, 0.0 }
 0xaaf   : > { %3217 = vpow2.f32 %v2180_v13 }
 0xab2   : > { %v2177_v46 = vpop.xlane.xlu0 %2176 }
 0xab3   : > { %v2312_v4 = vpop.f32.mrf.mxu3  ;;  %v2179_v53 = vsub.f32 %v2171_v52, %v2177_v46 }
 0xab4   : > { %v2318_v5 = vmul.f32 0.35355338, %v2312_v4 }
 0xab5   : > { %v2182_v14 = vmul.f32 1.442695, %v2179_v53  ;;  %v4286_v21 = vpop.eup %3217 }
 0xab6   : > { %v2320_v11 = vadd.f32 %v4226_v35, %v2318_v5  ;;  %v2184_v26 = vsel %vm1027_vm1, %v4286_v21, 0.0 }
 0xab7   : > { %3219 = vpow2.f32 %v2182_v14 }
 0xab8   : > { %v2322_v12 = vsel %vm1027_vm1, %v2320_v11, -inf }
 0xab9   : > { %2323 = vmax.xlane.f32.xlu2 %v2322_v12 }
 0xabb   : > { %2043 = vrot.lane.b32.xlu0 %v4247_v63, %s3647_s23  ;;  %v2315_v16 = vpop.f32.mrf.mxu3 }
 0xabc   : > { %v2319_v17 = vmul.f32 0.35355338, %v2315_v16 }
 0xabd   : > { %v4288_v28 = vpop.eup %3219 }
 0xabe   : > { %v2321_v19 = vadd.f32 %v4226_v35, %v2319_v17  ;;  %v2187_v25 = vsel %vm1027_vm1, %v4288_v28, 0.0 }
 0xac0   : > { %v2325_v20 = vsel %vm1027_vm1, %v2321_v19, -inf }
 0xac1   : > { %2010 = vadd.xlane.f32.xlu2 %v2009_v15  ;;  %2326 = vmax.xlane.f32.xlu1 %v2325_v20 }
 0xac9   : > { %2188 = vadd.xlane.f32.xlu2 %v2187_v25  ;;  %2185 = vadd.xlane.f32.xlu1 %v2184_v26 }
 0xb1a   : > { %v2008_v35 = vpop.xlane.xlu0 %2007 }
 0xb1b   : > { %3221 = vrcp.f32 %v2008_v35  ;;  %v2023_v31 = vand.u32 2147483648, %v2008_v35  ;;  %v2021_v32 = vand.u32 2147483647, %v2008_v35  ;;  %vm2017_vm10 = vweird.f32 %v2008_v35 }
 0xb1d   : > { %v2024_v59 = vor.u32 1.1754944e-38, %v2023_v31  ;;  %vm2022_vm12 = vcmp.eq.f32.partialorder %v2021_v32, 8.507059e+37 }
 0xb21   : > { %v3222_v27 = vpop.eup %3221 }
 0xb22   : > { %v2013_v29 = vmul.f32 %v3222_v27, %v2008_v35  ;;  %vm2018_vm9 = vweird.f32 %v3222_v27 }
 0xb23   : > { %vm2019_vm11 = vmor %vm2017_vm10, %vm2018_vm9 }
 0xb24   : > { %v2014_v30 = vsub.f32 1.0, %v2013_v29 }
 0xb26   : > { %v2015_v7 = vmul.f32 %v3222_v27, %v2014_v30 }
 0xb28   : > { %v2016_v33 = vadd.f32 %v3222_v27, %v2015_v7 }
 0xb2a   : > { %v2020_v6 = vsel %vm2019_vm11, %v3222_v27, %v2016_v33 }
 0xb2b   : > { %v2025_v10 = vsel %vm2022_vm12, %v2024_v59, %v2020_v6 }
 0xb2c   : > { %v2324_v36 = vpop.xlane.xlu2 %2323  ;;  %v2026_v34 = vmul.f32 %v3214_v54, %v2025_v10 }
 0xb2d   : > { %v2328_v9 = vsub.f32 %v2320_v11, %v2324_v36  ;;  %v2044_v37 = vpop.permute.xlu0 %2043 }
 0xb2e   : > { %2067 = vmatpush.msrb.mxu1 %v2044_v37 }
 0xb2f   : > { %v2330_v39 = vmul.f32 1.442695, %v2328_v9  ;;  %2934 = vmatmul.msk.f32.vlgmr.msrb.gmra.mxu1 %vm1027_vm1, %v2026_v34 }
 0xb31   : > { %3223 = vpow2.f32 %v2330_v39 }
 0xb34   : > { %v2327_v40 = vpop.xlane.xlu1 %2326  ;;  %v2011_v41 = vpop.xlane.xlu2 %2010 }
 0xb35   : > { %v2329_v42 = vsub.f32 %v2321_v19, %v2327_v40  ;;  %3225 = vrcp.f32 %v2011_v41  ;;  %v2038_v22 = vand.u32 2147483648, %v2011_v41  ;;  %v2036_v56 = vand.u32 2147483647, %v2011_v41 }
 0xb36   : > { %vm2032_vm14 = vweird.f32 %v2011_v41 }
 0xb37   : > { %v4295_v43 = vpop.eup %3223  ;;  %v2332_v44 = vmul.f32 1.442695, %v2329_v42  ;;  %v2039_v58 = vor.u32 1.1754944e-38, %v2038_v22  ;;  %vm2037_vm3 = vcmp.eq.f32.partialorder %v2036_v56, 8.507059e+37 }
 0xb38   : > { %v2334_v45 = vsel %vm1027_vm1, %v4295_v43, 0.0 }
 0xb39   : > { %3227 = vpow2.f32 %v2332_v44  ;;  %2335 = vadd.xlane.f32.xlu1 %v2334_v45 }
 0xb3b   : > { %v3226_v47 = vpop.eup %3225 }
 0xb3c   : > { %v2028_v48 = vmul.f32 %v3226_v47, %v2011_v41  ;;  %vm2033_vm13 = vweird.f32 %v3226_v47  ;;  %v2186_v1 = vpop.xlane.xlu1 %2185  ;;  %v4309_v2 = vpop.xlane.xlu2 %2188 }
 0xb3d   : > { %vm2034_vm15 = vmor %vm2032_vm14, %vm2033_vm13  ;;  %3229 = vrcp.f32 %v2186_v1  ;;  %vm2195_vm7 = vweird.f32 %v2186_v1  ;;  %v2201_v35 = vand.u32 2147483648, %v2186_v1  ;;  %v2199_v29 = vand.u32 2147483647, %v2186_v1 }
 0xb3e   : > { %v2029_v49 = vsub.f32 1.0, %v2028_v48  ;;  %3231 = vrcp.f32 %v4309_v2  ;;  %vm2210_vm14 = vweird.f32 %v4309_v2  ;;  %v2216_v42 = vand.u32 2147483648, %v4309_v2 }
 0xb3f   : > { %v4299_v50 = vpop.eup %3227  ;;  %v2202_v36 = vor.u32 1.1754944e-38, %v2201_v35  ;;  %vm2200_vm10 = vcmp.eq.f32.partialorder %v2199_v29, 8.507059e+37  ;;  %v2214_v48 = vand.u32 2147483647, %v4309_v2 }
 0xb40   : > { %v2030_v51 = vmul.f32 %v3226_v47, %v2029_v49  ;;  %v2337_v52 = vsel %vm1027_vm1, %v4299_v50, 0.0  ;;  %v2217_v56 = vor.u32 1.1754944e-38, %v2216_v42  ;;  %v2534_v42 = vld [vmem:[%s4534_s17 + $0x18] sm:$0xff] }
 0xb41   : > { %2338 = vadd.xlane.f32.xlu2 %v2337_v52 }
 0xb42   : > { %v2031_v57 = vadd.f32 %v3226_v47, %v2030_v51 }
 0xb43   : > { %v3230_v3 = vpop.eup %3229 }
 0xb44   : > { %v2035_v60 = vsel %vm2034_vm15, %v3226_v47, %v2031_v57  ;;  %v2191_v5 = vmul.f32 %v3230_v3, %v2186_v1  ;;  %v4313_v8 = vpop.eup %3231  ;;  %vm2196_vm5 = vweird.f32 %v3230_v3 }
 0xb45   : > { %v2040_v54 = vsel %vm2037_vm3, %v2039_v58, %v2035_v60  ;;  %v2206_v14 = vmul.f32 %v4313_v8, %v4309_v2  ;;  %vm2197_vm9 = vmor %vm2195_vm7, %vm2196_vm5  ;;  %vm2211_vm13 = vweird.f32 %v4313_v8  ;;  %vm2215_vm5 = vcmp.eq.f32.partialorder %v2214_v48, 8.507059e+37  ;;  %v1725_v58 = vld [vmem:[#allocation16 + $0x18] sm:$0xff]  ;;  %v1724_v60 = vld [vmem:[#allocation16 + $0x10] sm:$0xff] }
 0xb46   : > { %v2041_v23 = vmul.f32 %v4280_v18, %v2040_v54  ;;  %v2192_v11 = vsub.f32 1.0, %v2191_v5  ;;  %2273 = vmatpush.msra.mxu2 %v1724_v60  ;;  %v3160_v5 = vld [vmem:[%s4454_s13] ss:$0 sm:$0xff] }
 0xb47   : > { %v2207_v20 = vsub.f32 1.0, %v2206_v14 }
 0xb48   : > { %2935 = vmatmul.msk.f32.gmra.mxu1 %vm1027_vm1, %v2041_v23  ;;  %v2193_v13 = vmul.f32 %v3230_v3, %v2192_v11 }
 0xb49   : > { %v2208_v59 = vmul.f32 %v4313_v8, %v2207_v20 }
 0xb4a   : > { %v2194_v15 = vadd.f32 %v3230_v3, %v2193_v13 }
 0xb4b   : > { %v2209_v41 = vadd.f32 %v4313_v8, %v2208_v59 }
 0xb4c   : > { %v2198_v33 = vsel %vm2197_vm9, %v3230_v3, %v2194_v15 }
 0xb4d   : > { %v2203_v39 = vsel %vm2200_vm10, %v2202_v36, %v2198_v33  ;;  %v2537_v36 = vld [vmem:[%s4534_s17 + $0x30] sm:$0xff]  ;;  %vm2543_vm10 = vcmask 523264  }
 0xb4e   : > { %v2204_v45 = vmul.f32 %v4286_v21, %v2203_v39  ;;  %v2535_v39 = vld [vmem:[%s4534_s17 + $0x20] sm:$0xff] }
 0xb52   : > { %2220 = vrot.lane.b32.xlu1 %v4247_v63, %s3648_s21 }
 0xb59   : > { %2370 = vrot.lane.b32.xlu2 %v4247_v63, %s3649_s28 }
 0xbac   : > { %v2069_v4 = vpop.f32.mrf.mxu1  ;;  %v2336_v46 = vpop.xlane.xlu1 %2335 }
 0xbad   : > { %3233 = vrcp.f32 %v2336_v46  ;;  %2936 = vmatmul.msk.f32.vlgmr.msrb.gmra.mxu2 %vm1027_vm1, %v2069_v4  ;;  %v2351_v17 = vand.u32 2147483648, %v2336_v46  ;;  %v2349_v19 = vand.u32 2147483647, %v2336_v46  ;;  %vm2345_vm6 = vweird.f32 %v2336_v46 }
 0xbaf   : > { %v2352_v27 = vor.u32 1.1754944e-38, %v2351_v17  ;;  %vm2350_vm2 = vcmp.eq.f32.partialorder %v2349_v19, 8.507059e+37 }
 0xbb3   : > { %v3234_v53 = vpop.eup %3233 }
 0xbb4   : > { %v2341_v63 = vmul.f32 %v3234_v53, %v2336_v46  ;;  %v2339_v12 = vpop.xlane.xlu2 %2338  ;;  %vm2346_vm4 = vweird.f32 %v3234_v53 }
 0xbb5   : > { %3235 = vrcp.f32 %v2339_v12  ;;  %vm2347_vm8 = vmor %vm2345_vm6, %vm2346_vm4  ;;  %v2366_v34 = vand.u32 2147483648, %v2339_v12  ;;  %v2364_v37 = vand.u32 2147483647, %v2339_v12  ;;  %vm2360_vm12 = vweird.f32 %v2339_v12 }
 0xbb6   : > { %v2342_v16 = vsub.f32 1.0, %v2341_v63  ;;  %vm2212_vm4 = vmor %vm2210_vm14, %vm2211_vm13 }
 0xbb7   : > { %vm2365_vm3 = vcmp.eq.f32.partialorder %v2364_v37, 8.507059e+37  ;;  %v2213_v52 = vsel %vm2212_vm4, %v4313_v8, %v2209_v41 }
 0xbb8   : > { %v2343_v18 = vmul.f32 %v3234_v53, %v2342_v16  ;;  %v2218_v21 = vsel %vm2215_vm5, %v2217_v56, %v2213_v52 }
 0xbb9   : > { %v2219_v57 = vmul.f32 %v4288_v28, %v2218_v21 }
 0xbba   : > { %v2344_v25 = vadd.f32 %v3234_v53, %v2343_v18 }
 0xbbb   : > { %v3236_v26 = vpop.eup %3235 }
 0xbbc   : > { %v2348_v30 = vsel %vm2347_vm8, %v3234_v53, %v2344_v25  ;;  %v2356_v31 = vmul.f32 %v3236_v26, %v2339_v12  ;;  %v2371_v7 = vpop.permute.xlu2 %2370  ;;  %vm2361_vm11 = vweird.f32 %v3236_v26 }
 0xbbd   : > { %v2353_v32 = vsel %vm2350_vm2, %v2352_v27, %v2348_v30  ;;  %2394 = vmatpush.msrb.mxu0 %v2371_v7  ;;  %vm2362_vm15 = vmor %vm2360_vm12, %vm2361_vm11  ;;  %v2493_v7 = vld [vmem:[#allocation17 + $0x8] sm:$0xff] }
 0xbbe   : > { %v2357_v6 = vsub.f32 1.0, %v2356_v31  ;;  %v2354_v10 = vmul.f32 %v4295_v43, %v2353_v32  ;;  %v2367_v43 = vor.u32 1.1754944e-38, %v2366_v34  ;;  %v2494_v31 = vld [vmem:[#allocation17 + $0x10] sm:$0xff]  ;;  %v2492_v32 = vld [vmem:[#allocation17] sm:$0xff] }
 0xbbf   : > { %v2536_v34 = vld [vmem:[%s4534_s17 + $0x28] sm:$0xff] }
 0xbc0   : > { %v2358_v9 = vmul.f32 %v3236_v26, %v2357_v6  ;;  %2950 = vmatmul.msk.f32.vlgmr.msrb.gmra.mxu0 %vm1027_vm1, %v2354_v10  ;;  %v2538_v10 = vld [vmem:[%s4534_s17 + $0x38] sm:$0xff] }
 0xbc1   : > { %2558 = vmatpush.msrb.mxu3 %v2538_v10 }
 0xbc2   : > { %v2359_v40 = vadd.f32 %v3236_v26, %v2358_v9 }
 0xbc3   : > { %2559 = vmatpush.msrb.mxu3 %v2537_v36 }
 0xbc4   : > { %v2221_v44 = vpop.permute.xlu1 %2220  ;;  %v2363_v47 = vsel %vm2362_vm15, %v3236_v26, %v2359_v40 }
 0xbc5   : > { %v2072_v49 = vpop.f32.mrf.mxu1  ;;  %2244 = vmatpush.msra.mxu1 %v2221_v44  ;;  %v2368_v22 = vsel %vm2365_vm3, %v2367_v43, %v2363_v47  ;;  %2560 = vmatpush.msrb.mxu3 %v2536_v34 }
 0xbc6   : > { %2937 = vmatmul.msk.f32.gmra.mxu2 %vm1027_vm1, %v2072_v49  ;;  %2943 = vmatmul.msk.f32.vlgmr.msra.gmra.mxu1 %vm1027_vm1, %v2204_v45  ;;  %v2369_v51 = vmul.f32 %v4299_v50, %v2368_v22 }
 0xbc7   : > { %2423 = vmatpush.msrb.mxu1 %v1725_v58  ;;  %2561 = vmatpush.msrb.mxu3 %v2535_v39 }
 0xbc8   : > { %2951 = vmatmul.msk.f32.gmra.mxu0 %vm1027_vm1, %v2369_v51  ;;  %v3161_v51 = vld [vmem:[%s4459_s18 + $0x1] ss:$0 sm:$0xff] }
 0xbc9   : > { %2562 = vmatpush.msrb.mxu3 %v2534_v42 }
 0xbce   : > { %2944 = vmatmul.msk.f32.gmra.mxu1 %vm1027_vm1, %v2219_v57  ;;  %v3162_v57 = vld [vmem:[%s4460_s19 + $0x1] ss:$0 sm:$0xff] }
 0xc30   : > { %v2098_v1 = vpop.f32.mrf.mxu2 }
 0xc31   : > { %v2128_v2 = vadd.f32 %v4271_v61, %v2098_v1 }
 0xc3d   : > { %v2396_v54 = vpop.f32.mrf.mxu0 }
 0xc3e   : > { %2952 = vmatmul.msk.f32.vlgmr.msrb.gmra.mxu1 %vm1027_vm1, %v2396_v54 }
 0xc43   : > { %v2246_v23 = vpop.f32.mrf.mxu1 }
 0xc44   : > { %2945 = vmatmul.msk.f32.vlgmr.msra.gmra.mxu2 %vm1027_vm1, %v2246_v23 }
 0xc45   : > { %v2399_v50 = vpop.f32.mrf.mxu0 }
 0xc46   : > { %2953 = vmatmul.msk.f32.gmra.mxu1 %vm1027_vm1, %v2399_v50 }
 0xc49   : > { %v2101_v28 = vpop.f32.mrf.mxu2 }
 0xc4a   : > { %v2131_v53 = vadd.f32 %v4274_v62, %v2101_v28 }
 0xc4b   : > { %v2249_v0 = vpop.f32.mrf.mxu1 }
 0xc4c   : > { %2946 = vmatmul.msk.f32.gmra.mxu2 %vm1027_vm1, %v2249_v0 }
 0xcbb   : > { %v2425_v3 = vpop.f32.mrf.mxu1 }
 0xcc3   : > { %v2428_v16 = vpop.f32.mrf.mxu1 }
 0xcc7   : > { %v2275_v4 = vpop.f32.mrf.mxu2 }
 0xcc8   : > { %v2281_v46 = vadd.f32 %v2275_v4, %v2128_v2  ;;  %v2532_v4 = vld [vmem:[%s4534_s17 + $0x8] sm:$0xff] }
 0xcca   : > { %v2431_v8 = vadd.f32 %v2425_v3, %v2281_v46  ;;  %v2533_v3 = vld [vmem:[%s4534_s17 + $0x10] sm:$0xff]  ;;  %v2531_v46 = vld [vmem:[%s4534_s17] sm:$0xff] }
 0xccb   : > { %2563 = vmatpush.msrb.mxu3 %v2533_v3 }
 0xccc   : > { %v2436_v11 = vadd.f32 %v3160_v5, %v2431_v8 }
 0xccd   : > { %2564 = vmatpush.msrb.mxu3 %v2532_v4 }
 0xcce   : > { %v2438_v63 = vadd.f32 %v2436_v11, %v4206_v24 }
 0xccf   : > { %v2278_v12 = vpop.f32.mrf.mxu2  ;;  %2565 = vmatpush.msrb.mxu3 %v2531_v46 }
 0xcd0   : > { %v2282_v13 = vadd.f32 %v2278_v12, %v2131_v53  ;;  %v2442_v14 = vsel %vm911_vm0, %v2438_v63, 0.0 }
 0xcd1   : > { %2443 = vadd.xlane.f32.xlu0 %v2442_v14  ;;  %v3164_v14 = vld [vmem:[%s4536_s20] ss:$0 sm:$0xff] }
 0xcd2   : > { %v2432_v61 = vadd.f32 %v2428_v16, %v2282_v13 }
 0xcd4   : > { %v2437_v17 = vadd.f32 %v3160_v5, %v2432_v61  ;;  %v3163_v5 = vld [vmem:[%s4535_s9] ss:$0 sm:$0xff]  ;;  %s3559_s9 = sshra.s32 %s2645_s30, 4  ;;  %s3560_s9 = int_to_ptr.hbm [resolvable:$true] %s3559_s9 }
 0xcd5   : > { %s3561_s16 = scalar_lea.hbm %s3560_s9, 16  ;;  %p3566_p3 = scmp.lt.s32.totalorder %s3560_s9, %s4537_s11 }
 0xcd6   : > { %v2439_v18 = vadd.f32 %v2437_v17, %v4211_v55  ;;  %v2495_v55 = vld [vmem:[#allocation17 + $0x18] sm:$0xff]  ;;  %p3562_p10 = scmp.ne.s32.totalorder %s3560_s9, %s3561_s16  ;;  %p3567_p8 = scmp.lt.s32.totalorder %s3565_s1, %s3561_s16 }
 0xcd7   : > { %2518 = vmatpush.msrb.mxu2 %v2495_v55 }
 0xcd8   : > { %v2445_v19 = vsel %vm911_vm0, %v2439_v18, 0.0  ;;  %p3563_p6 = pnand %p3562_p10, %p3837_p0  ;;  %p3568_p9 = por %p3567_p8, %p3566_p3 }
 0xcd9   : > { %2446 = vadd.xlane.f32.xlu1 %v2445_v19  ;;  %2519 = vmatpush.msrb.mxu2 %v2494_v31 }
 0xcda   : > { %p3564_p11 = pneg %p3563_p6 }
 0xcdb   : > { %2520 = vmatpush.msrb.mxu2 %v2493_v7 }
 0xcdc   : > { %p3569_p12 = pnand %p3568_p9, %p3564_p11 }
 0xcdd   : > { %2521 = vmatpush.msrb.mxu2 %v2492_v32 }
 0xd44   : > { %v2444_v15 = vpop.xlane.xlu0 %2443 }
 0xd45   : > { %v2448_v20 = vmul.f32 %v2444_v15, %v4181_v38 }
 0xd47   : > { %v2450_v25 = vsub.f32 %v2438_v63, %v2448_v20 }
 0xd49   : > { %v2452_v62 = vmul.f32 %v2450_v25, %v2450_v25 }
 0xd4b   : > { %v2454_v24 = vsel %vm911_vm0, %v2452_v62, 0.0 }
 0xd4c   : > { %2455 = vadd.xlane.f32.xlu2 %v2454_v24  ;;  %v2447_v26 = vpop.xlane.xlu1 %2446 }
 0xd4d   : > { %v2449_v35 = vmul.f32 %v2447_v26, %v4181_v38 }
 0xd4f   : > { %v2451_v27 = vsub.f32 %v2439_v18, %v2449_v35 }
 0xd51   : > { %v2453_v29 = vmul.f32 %v2451_v27, %v2451_v27 }
 0xd53   : > { %v2457_v30 = vsel %vm911_vm0, %v2453_v29, 0.0 }
 0xd54   : > { %2458 = vadd.xlane.f32.xlu0 %v2457_v30 }
 0xdbf   : > { %v2456_v33 = vpop.xlane.xlu2 %2455 }
 0xdc0   : > { %v2460_v59 = vmul.f32 %v2456_v33, %v4181_v38 }
 0xdc2   : > { %v2462_v6 = vadd.f32 1e-05, %v2460_v59 }
 0xdc4   : > { %3237 = vrsqrt.f32 %v2462_v6  ;;  %vm2470_vm6 = vweird.f32 %v2462_v6 }
 0xdc7   : > { %v2459_v9 = vpop.xlane.xlu0 %2458 }
 0xdc8   : > { %v2461_v37 = vmul.f32 %v2459_v9, %v4181_v38 }
 0xdca   : > { %v3238_v40 = vpop.eup %3237  ;;  %v2463_v41 = vadd.f32 1e-05, %v2461_v37 }
 0xdcb   : > { %v2465_v43 = vmul.f32 %v3238_v40, %v2462_v6  ;;  %vm2471_vm1 = vweird.f32 %v3238_v40 }
 0xdcc   : > { %3239 = vrsqrt.f32 %v2463_v41  ;;  %vm2472_vm7 = vmor %vm2470_vm6, %vm2471_vm1  ;;  %vm2480_vm2 = vweird.f32 %v2463_v41 }
 0xdcd   : > { %v2466_v44 = vmul.f32 %v3238_v40, %v2465_v43 }
 0xdcf   : > { %v2467_v45 = vmul.f32 0.5, %v2466_v44  ;;  %v3165_v44 = vld [vmem:[%s4459_s18 + $0x2] ss:$0 sm:$0xff] }
 0xdd1   : > { %v2468_v47 = vsub.f32 1.5, %v2467_v45 }
 0xdd2   : > { %v3240_v48 = vpop.eup %3239 }
 0xdd3   : > { %v2469_v49 = vmul.f32 %v3238_v40, %v2468_v47  ;;  %v2475_v22 = vmul.f32 %v3240_v48, %v2463_v41  ;;  %vm2481_vm8 = vweird.f32 %v3240_v48  ;;  %v3166_v47 = vld [vmem:[%s4460_s19 + $0x2] ss:$0 sm:$0xff] }
 0xdd4   : > { %vm2482_vm9 = vmor %vm2480_vm2, %vm2481_vm8 }
 0xdd5   : > { %v2473_v52 = vsel %vm2472_vm7, %v3238_v40, %v2469_v49  ;;  %v2476_v56 = vmul.f32 %v3240_v48, %v2475_v22 }
 0xdd6   : > { %v2484_v21 = vmul.f32 %v2473_v52, %v2450_v25 }
 0xdd7   : > { %v2477_v58 = vmul.f32 0.5, %v2476_v56 }
 0xdd8   : > { %v2487_v60 = vmul.f32 %v3161_v51, %v2484_v21 }
 0xdd9   : > { %v2478_v54 = vsub.f32 1.5, %v2477_v58 }
 0xdda   : > { %v2490_v23 = vadd.f32 %v3162_v57, %v2487_v60 }
 0xddb   : > { %v2479_v50 = vmul.f32 %v3240_v48, %v2478_v54 }
 0xddc   : > { %2954 = vmatmul.msk.f32.vlgmr.msrb.gmra.mxu2 %vm911_vm0, %v2490_v23 }
 0xddd   : > { %v2483_v0 = vsel %vm2482_vm9, %v3240_v48, %v2479_v50 }
 0xdde   : > { %v2485_v1 = vmul.f32 %v2483_v0, %v2451_v27 }
 0xde0   : > { %v2488_v28 = vmul.f32 %v3161_v51, %v2485_v1 }
 0xde2   : > { %v2491_v2 = vadd.f32 %v3162_v57, %v2488_v28 }
 0xde4   : > { %2955 = vmatmul.msk.f32.gmra.mxu2 %vm911_vm0, %v2491_v2 }
 0xe5f   : > { %v2523_v8 = vpop.f32.mrf.mxu2 }
 0xe60   : > { %v2524_v11 = vadd.f32 %v3163_v5, %v2523_v8 }
 0xe62   : > { %v2529_v53 = vmax.f32 %v2524_v11, 0.0 }
 0xe64   : > { %2956 = vmatmul.msk.f32.vlgmr.msrb.gmra.mxu3 %vm2543_vm10, %v2529_v53 }
 0xe67   : > { %v2526_v63 = vpop.f32.mrf.mxu2 }
 0xe68   : > { %v2527_v12 = vadd.f32 %v3163_v5, %v2526_v63 }
 0xe6a   : > { %v2530_v13 = vmax.f32 %v2527_v12, 0.0 }
 0xe6c   : > { %2957 = vmatmul.msk.f32.gmra.mxu3 %vm2543_vm10, %v2530_v13 }
 0xee7   : > { %v2567_v16 = vpop.f32.mrf.mxu3 }
 0xee8   : > { %v2568_v61 = vadd.f32 %v3164_v14, %v2567_v16 }
 0xeea   : > { %v2573_v17 = vadd.f32 %v2568_v61, %v2490_v23 }
 0xeec   : > { %v2577_v18 = vsel %vm911_vm0, %v2573_v17, 0.0 }
 0xeed   : > { %2578 = vadd.xlane.f32.xlu0 %v2577_v18 }
 0xeef   : > { %v2570_v19 = vpop.f32.mrf.mxu3 }
 0xef0   : > { %v2571_v15 = vadd.f32 %v3164_v14, %v2570_v19 }
 0xef2   : > { %v2574_v20 = vadd.f32 %v2571_v15, %v2491_v2 }
 0xef4   : > { %v2580_v25 = vsel %vm911_vm0, %v2574_v20, 0.0 }
 0xef5   : > { %2581 = vadd.xlane.f32.xlu0 %v2580_v25 }
 0xf60   : > { %v2579_v62 = vpop.xlane.xlu0 %2578 }
 0xf61   : > { %v2583_v24 = vmul.f32 %v2579_v62, %v4181_v38 }
 0xf63   : > { %v2585_v26 = vsub.f32 %v2573_v17, %v2583_v24 }
 0xf65   : > { %v2587_v35 = vmul.f32 %v2585_v26, %v2585_v26 }
 0xf67   : > { %v2589_v27 = vsel %vm911_vm0, %v2587_v35, 0.0 }
 0xf68   : > { %2590 = vadd.xlane.f32.xlu1 %v2589_v27  ;;  %v2582_v29 = vpop.xlane.xlu0 %2581 }
 0xf69   : > { %v2584_v30 = vmul.f32 %v2582_v29, %v4181_v38 }
 0xf6b   : > { %v2586_v55 = vsub.f32 %v2574_v20, %v2584_v30 }
 0xf6d   : > { %v2588_v31 = vmul.f32 %v2586_v55, %v2586_v55 }
 0xf6f   : > { %v2592_v7 = vsel %vm911_vm0, %v2588_v31, 0.0 }
 0xf70   : > { %2593 = vadd.xlane.f32.xlu2 %v2592_v7 }
 0xfdb   : > { %v2591_v32 = vpop.xlane.xlu1 %2590 }
 0xfdc   : > { %v2595_v33 = vmul.f32 %v2591_v32, %v4181_v38 }
 0xfde   : > { %v2597_v59 = vadd.f32 1e-05, %v2595_v33 }
 0xfe0   : > { %3241 = vrsqrt.f32 %v2597_v59  ;;  %vm2605_vm12 = vweird.f32 %v2597_v59 }
 0xfe3   : > { %v2594_v6 = vpop.xlane.xlu2 %2593 }
 0xfe4   : > { %v2596_v10 = vmul.f32 %v2594_v6, %v4181_v38 }
 0xfe6   : > { %v3242_v36 = vpop.eup %3241  ;;  %v2598_v34 = vadd.f32 1e-05, %v2596_v10 }
 0xfe7   : > { %v2600_v9 = vmul.f32 %v3242_v36, %v2597_v59  ;;  %vm2606_vm11 = vweird.f32 %v3242_v36 }
 0xfe8   : > { %3243 = vrsqrt.f32 %v2598_v34  ;;  %vm2607_vm13 = vmor %vm2605_vm12, %vm2606_vm11  ;;  %vm2615_vm15 = vweird.f32 %v2598_v34 }
 0xfe9   : > { %v2601_v37 = vmul.f32 %v3242_v36, %v2600_v9 }
 0xfeb   : > { %v2602_v39 = vmul.f32 0.5, %v2601_v37 }
 0xfed   : > { %v2603_v40 = vsub.f32 1.5, %v2602_v39 }
 0xfee   : > { %v3244_v41 = vpop.eup %3243 }
 0xfef   : > { %v2604_v42 = vmul.f32 %v3242_v36, %v2603_v40  ;;  %v2610_v43 = vmul.f32 %v3244_v41, %v2598_v34  ;;  %vm2616_vm14 = vweird.f32 %v3244_v41 }
 0xff0   : > { %vm2617_vm3 = vmor %vm2615_vm15, %vm2616_vm14 }
 0xff1   : > { %v2608_v38 = vsel %vm2607_vm13, %v3242_v36, %v2604_v42  ;;  %v2611_v45 = vmul.f32 %v3244_v41, %v2610_v43 }
 0xff2   : > { %v2619_v48 = vmul.f32 %v2608_v38, %v2585_v26 }
 0xff3   : > { %v2612_v49 = vmul.f32 0.5, %v2611_v45 }
 0xff4   : > { %v2622_v22 = vmul.f32 %v3165_v44, %v2619_v48 }
 0xff5   : > { %v2613_v51 = vsub.f32 1.5, %v2612_v49 }
 0xff6   : > { %v2625_v52 = vadd.f32 %v3166_v47, %v2622_v22 }
 0xff7   : > { %v2614_v56 = vmul.f32 %v3244_v41, %v2613_v51 }
 0xff8   : > { %2627 = vst.msk [vmem:[%s877_s25] sm:$0xff] %vm911_vm0, %v2625_v52 }
 0xff9   : > { %v2618_v21 = vsel %vm2617_vm3, %v3244_v41, %v2614_v56 }
 0xffa   : > { %v2620_v57 = vmul.f32 %v2618_v21, %v2586_v55 }
 0xffc   : > { %v2623_v58 = vmul.f32 %v3165_v44, %v2620_v57 }
 0xffe   : > { %v2626_v60 = vadd.f32 %v3166_v47, %v2623_v58 }
0x1000   : > { %2628 = vst.msk [vmem:[%s877_s25 + $0x8] sm:$0xff] %vm911_vm0, %v2626_v60 }
0x1001   : > { %3572 = shalt.err (!%p3569_p12)
}
0x1002   : > { %s3651_s29 = smov 128   ;;  %s3652_s28 = smov 8  }
0x1003   : > { %2998 = dma.vmem_to_hbm [thread:$0]  (%p3837_p0), %s2643_s0, 256, %s2645_s30, %s2630_s26, %s3651_s29, %s3651_s29, %s3652_s28  }
0x1004 PF: > { %s4539_s14 = sld [smem:[#allocation28_spill]]  ;;  %p4541_p2 = scmp.ge.s32.totalorder %s3635_s24, 2 }
0x1006   : > { %p3033_p4 = pnand %p4541_p2, %p3845_p5 }
0x1008   : > { %p3034_p13 = pneg %p3033_p4 }
0x100a   : > { %s2659_s4 = sand.u32 1, %s4539_s14  }
0x100b   : > { %s2660_s3 = scalar_lea.sflag [#allocation4], %s2659_s4 }
0x100c   : > { %3618 = dma.done.wait (%p3034_p13), %s2660_s3, 256  }
0x100d   : > { %3620 = vsyncadd (%p3034_p13), %s2660_s3, 4294967040  ;;  %s4542_s24 = sld [smem:[#allocation30_spill]]  ;;  %s4545_s1 = smov %s3627_s22 }
0x100e   : > { %s4543_s12 = sld [smem:[#allocation29_spill]] }
0x100f   : > { %s4544_s23 = sld [smem:[#allocation31_spill]] }
0x1013   : > { %p42_p1 = scmp.ge.s32.totalorder %s4542_s24, 4  }
0x1014   : > { %s4546_s22 = smov %s4543_s12 }
0x1015   :  { %44 = sbr.rel (!%p42_p1) target bundleno = 28 (0x1c), region = 212 }
0x101a   :  { %2666 = vsyncpa [#allocation3], 1 }
0x101b   :  { %2668 = vsyncpa [#allocation3 + $0x1], 1 }
0x101c   :  { %2669 = vsyncpa [#allocation6], 1 }
0x101d   :  { %2671 = vsyncpa [#allocation6 + $0x1], 1 }
0x101e   :  { %2672 = vsyncpa [#allocation9], 1 }
0x101f   :  { %2674 = vsyncpa [#allocation9 + $0x1], 1 }
0x1020   :  { %2675 = vsyncpa [#allocation12], 1 }
0x1021   :  { %2676 = vsyncpa [#allocation15], 1 }
0x1022   :  { %2677 = vsyncpa [#allocation18], 1 }
0x1023   :  { %2678 = vsyncpa [#allocation4], 1 }
0x1024   :  { %2680 = vsyncpa [#allocation4 + $0x1], 1 }

</bundles_post_ra>
